<compile_context>
chip_gen: v6e
topology: v6e:2x2x1
jax: 0.10.0
libtpu: 0.0.40
codegen_flags: <defaults>
</compile_context>

<pallas_src>
import functools

import jax
import jax.numpy as jnp
from jax.experimental import pallas as pl
from jax.experimental.pallas import tpu as pltpu

LN_EPS = 1e-12  # BERT LayerNorm epsilon

# Small, lane-dense synthetic config (MiniLM-L6-H384 scaled down):
# hidden=128, 4 heads, head_dim=32, intermediate=256, 2 layers.
CFG = dict(vocab=128, hidden=128, layers=2, heads=4, head_dim=32,
           intermediate=256, max_pos=64, type_vocab=2, labels=2)
assert CFG["heads"] * CFG["head_dim"] == CFG["hidden"]


def _layernorm(x, gamma, beta):
    """LayerNorm over the last (hidden) axis, f32 statistics."""
    mu = jnp.mean(x, axis=-1, keepdims=True)
    d = x - mu
    var = jnp.mean(d * d, axis=-1, keepdims=True)
    return d * jax.lax.rsqrt(var + LN_EPS) * gamma + beta


# ---------------------------------------------------------------------------
# Fused kernel body.  Grid = (batch, layers):
#   program_id(0) = sequence index (parallel), program_id(1) = layer (arbitrary)
# Each grid step processes ONE sequence through ONE encoder layer; the running
# activation is kept in a persistent VMEM scratch across the layer axis.
# ---------------------------------------------------------------------------
def _encoder_kernel(
    emb_ref,                        # [1, S, H]  f32 (this sequence's embeddings)
    emb_ln_g_ref, emb_ln_b_ref,     # [1, H]     f32
    wqkv_ref, bqkv_ref,             # [1, H, 3H] bf16 / [1, 1, 3H] f32 (this layer)
    wo_ref, bo_ref,                 # [1, H, H]  bf16 / [1, 1, H]  f32
    ln1_g_ref, ln1_b_ref,           # [1, 1, H]  f32
    wi_ref, bi_ref,                 # [1, H, I]  bf16 / [1, 1, I]  f32
    wo2_ref, bo2_ref,               # [1, I, H]  bf16 / [1, 1, H]  f32
    ln2_g_ref, ln2_b_ref,           # [1, 1, H]  f32
    pooler_w_ref, pooler_b_ref,     # [H, H] bf16 / [1, H] f32
    cls_w_ref, cls_b_ref,           # [H, Lab] bf16 / [1, Lab] f32
    logits_ref,                     # out: [1, 1, Lab] f32
    h_scr,                          # scratch: [S, H] f32 (persists across layers)
    *, seq, heads, head_dim,
):
    H = heads * head_dim
    layer = pl.program_id(1)
    n_layers = pl.num_programs(1)
    scale = 1.0 / (float(head_dim) ** 0.5)

    # ---- embedding LayerNorm, only once per sequence ------------------------
    @pl.when(layer == 0)
    def _():
        h_scr[...] = _layernorm(emb_ref[0], emb_ln_g_ref[...], emb_ln_b_ref[...])

    h = h_scr[...]                                             # [S, H] f32
    hb = h.astype(jnp.bfloat16)

    # ---- fused QKV projection: one [S, H] x [H, 3H] matmul ------------------
    qkv = jnp.dot(hb, wqkv_ref[0],
                  preferred_element_type=jnp.float32) + bqkv_ref[0]   # [S, 3H]
    qkv_b = qkv.astype(jnp.bfloat16)                            # cast once

    # ---- attention: small static unroll over heads (lane slices only) -------
    ctx_heads = []
    for hh in range(heads):
        c0 = hh * head_dim
        qh = qkv_b[:, c0:c0 + head_dim]                         # [S, D] bf16
        kh = qkv_b[:, H + c0:H + c0 + head_dim]                 # [S, D] bf16
        vh = qkv_b[:, 2 * H + c0:2 * H + c0 + head_dim]         # [S, D] bf16
        # scores = qh @ kh^T (contraction on last dims; no mask: HF all-ones)
        s = jax.lax.dot_general(qh, kh, (((1,), (1,)), ((), ())),
                                preferred_element_type=jnp.float32) * scale
        m = jnp.max(s, axis=-1, keepdims=True)
        p = jnp.exp(s - m)
        p = p * pl.reciprocal(jnp.sum(p, axis=-1, keepdims=True), approx=True)
        ctx_heads.append(jnp.dot(p.astype(jnp.bfloat16), vh,
                                 preferred_element_type=jnp.float32))  # [S, D]
    ctx = jnp.concatenate(ctx_heads, axis=-1)                   # [S, H] head-major

    # ---- single output projection with contraction depth K = H --------------
    attn = jnp.dot(ctx.astype(jnp.bfloat16), wo_ref[0],
                   preferred_element_type=jnp.float32) + bo_ref[0]    # [S, H]
    h = _layernorm(attn + h, ln1_g_ref[0], ln1_b_ref[0])

    # ---- feed forward (tanh-GELU on EUP) + residual LN -----------------------
    inter = jax.nn.gelu(
        jnp.dot(h.astype(jnp.bfloat16), wi_ref[0],
                preferred_element_type=jnp.float32) + bi_ref[0],
        approximate=True)                                       # [S, I]
    ffn = jnp.dot(inter.astype(jnp.bfloat16), wo2_ref[0],
                  preferred_element_type=jnp.float32) + bo2_ref[0]    # [S, H]
    h = _layernorm(ffn + h, ln2_g_ref[0], ln2_b_ref[0])
    h_scr[...] = h

    # ---- pooler (tanh on [CLS]) + classifier, only after the last layer -----
    @pl.when(layer == n_layers - 1)
    def _():
        cls = h[0:1, :]                                         # [1, H] CLS row
        pooled = jnp.tanh(
            jnp.dot(cls.astype(jnp.bfloat16), pooler_w_ref[...],
                    preferred_element_type=jnp.float32) + pooler_b_ref[...])
        logits = (jnp.dot(pooled.astype(jnp.bfloat16), cls_w_ref[...],
                          preferred_element_type=jnp.float32)
                  + cls_b_ref[...])                             # [1, Lab]
        logits_ref[...] = logits.reshape(logits_ref.shape)


# ---------------------------------------------------------------------------
# Deterministic synthetic parameter init (shapes follow BERT/MiniLM config)
# ---------------------------------------------------------------------------
def init_params(key):
    H, I, Lab = CFG["hidden"], CFG["intermediate"], CFG["labels"]
    Lyr = CFG["layers"]

    def normal(k, shape, dtype=jnp.float32):
        return (0.02 * jax.random.normal(k, shape, jnp.float32)).astype(dtype)

    keys = iter(jax.random.split(key, 5 + 6 * Lyr))
    p = {
        "word_emb": normal(next(keys), (CFG["vocab"], H)),
        "pos_emb": normal(next(keys), (CFG["max_pos"], H)),
        "type_emb": normal(next(keys), (CFG["type_vocab"], H)),
        "emb_ln_g": jnp.ones((1, H), jnp.float32),
        "emb_ln_b": jnp.zeros((1, H), jnp.float32),
        "pooler_w": normal(next(keys), (H, H), jnp.bfloat16),
        "pooler_b": jnp.zeros((1, H), jnp.float32),
        "cls_w": normal(next(keys), (H, Lab), jnp.bfloat16),
        "cls_b": jnp.zeros((1, Lab), jnp.float32),
    }

    wqkv, bqkv, wo, bo = [], [], [], []
    ln1g, ln1b, wi, bi, wo2, bo2, ln2g, ln2b = ([] for _ in range(8))
    for _ in range(Lyr):
        wq = normal(next(keys), (H, H))
        wk = normal(next(keys), (H, H))
        wv = normal(next(keys), (H, H))
        # Merged QKV weight -> one matmul per layer.
        wqkv.append(jnp.concatenate([wq, wk, wv], axis=1).astype(jnp.bfloat16))
        bqkv.append(jnp.zeros((1, 3 * H), jnp.float32))
        wo.append(normal(next(keys), (H, H), jnp.bfloat16))
        bo.append(jnp.zeros((1, H), jnp.float32))
        ln1g.append(jnp.ones((1, H), jnp.float32))
        ln1b.append(jnp.zeros((1, H), jnp.float32))
        wi.append(normal(next(keys), (H, I), jnp.bfloat16))
        bi.append(jnp.zeros((1, I), jnp.float32))
        wo2.append(normal(next(keys), (I, H), jnp.bfloat16))
        bo2.append(jnp.zeros((1, H), jnp.float32))
        ln2g.append(jnp.ones((1, H), jnp.float32))
        ln2b.append(jnp.zeros((1, H), jnp.float32))

    p.update(
        wqkv=jnp.stack(wqkv), bqkv=jnp.stack(bqkv),
        wo=jnp.stack(wo), bo=jnp.stack(bo),
        ln1_g=jnp.stack(ln1g), ln1_b=jnp.stack(ln1b),
        wi=jnp.stack(wi), bi=jnp.stack(bi),
        wo2=jnp.stack(wo2), bo2=jnp.stack(bo2),
        ln2_g=jnp.stack(ln2g), ln2_b=jnp.stack(ln2b),
    )
    return p


# ---------------------------------------------------------------------------
# Forward pass (returns only the logits, matching OnlyLogitsHuggingFaceModel)
# ---------------------------------------------------------------------------
def forward(params, input_ids):
    B, S = input_ids.shape
    H, NH, D = CFG["hidden"], CFG["heads"], CFG["head_dim"]
    I, Lyr, Lab = CFG["intermediate"], CFG["layers"], CFG["labels"]

    # Embedding gather / adds are glue; everything else runs in ONE Pallas call.
    we = params["word_emb"][input_ids]                    # [B, S, H]
    pe = params["pos_emb"][:S][None, :, :]                # [1, S, H]
    te = params["type_emb"][0][None, None, :]             # token_type_ids == 0
    emb = (we + pe + te).astype(jnp.float32)              # [B, S, H]

    kernel = functools.partial(_encoder_kernel, seq=S, heads=NH, head_dim=D)

    per_seq = lambda b, l: (b, 0, 0)        # per-sequence blocks
    per_layer = lambda b, l: (l, 0, 0)      # per-layer (pipelined) weight blocks
    const2 = lambda b, l: (0, 0)            # shared small 2-D params

    args = (
        emb,
        params["emb_ln_g"], params["emb_ln_b"],
        params["wqkv"], params["bqkv"],
        params["wo"], params["bo"],
        params["ln1_g"], params["ln1_b"],
        params["wi"], params["bi"],
        params["wo2"], params["bo2"],
        params["ln2_g"], params["ln2_b"],
        params["pooler_w"], params["pooler_b"],
        params["cls_w"], params["cls_b"],
    )
    in_specs = [
        pl.BlockSpec((1, S, H), per_seq),                              # emb
        pl.BlockSpec((1, H), const2), pl.BlockSpec((1, H), const2),    # emb LN
        pl.BlockSpec((1, H, 3 * H), per_layer),                        # wqkv
        pl.BlockSpec((1, 1, 3 * H), per_layer),                        # bqkv
        pl.BlockSpec((1, H, H), per_layer),                            # wo
        pl.BlockSpec((1, 1, H), per_layer),                            # bo
        pl.BlockSpec((1, 1, H), per_layer),                            # ln1_g
        pl.BlockSpec((1, 1, H), per_layer),                            # ln1_b
        pl.BlockSpec((1, H, I), per_layer),                            # wi
        pl.BlockSpec((1, 1, I), per_layer),                            # bi
        pl.BlockSpec((1, I, H), per_layer),                            # wo2
        pl.BlockSpec((1, 1, H), per_layer),                            # bo2
        pl.BlockSpec((1, 1, H), per_layer),                            # ln2_g
        pl.BlockSpec((1, 1, H), per_layer),                            # ln2_b
        pl.BlockSpec((H, H), const2), pl.BlockSpec((1, H), const2),    # pooler
        pl.BlockSpec((H, Lab), const2), pl.BlockSpec((1, Lab), const2),  # classifier
    ]
    out_spec = pl.BlockSpec((1, 1, Lab), per_seq)

    # Advisory cost hint so XLA schedules the gather glue around the kernel.
    flops = int(B * Lyr * (2 * S * H * 3 * H          # QKV
                           + 4 * NH * S * S * D       # scores + p@v
                           + 2 * S * H * H            # out projection
                           + 4 * S * H * I)           # FFN
                + 2 * B * H * (H + Lab))              # pooler + classifier
    trans = int(B * Lyr * (NH * S * S + S * I + 2 * S) + B * (H + S))
    bytes_acc = int(sum(int(a.size) * a.dtype.itemsize for a in args)
                    + B * Lab * 4)

    logits = pl.pallas_call(
        kernel,
        out_shape=jax.ShapeDtypeStruct((B, 1, Lab), jnp.float32),
        grid_spec=pltpu.PrefetchScalarGridSpec(
            num_scalar_prefetch=0,
            grid=(B, Lyr),
            in_specs=in_specs,
            out_specs=out_spec,
            scratch_shapes=[pltpu.VMEM((S, H), jnp.float32)],   # persistent h
        ),
        compiler_params=pltpu.CompilerParams(
            dimension_semantics=("parallel", "arbitrary"),
            vmem_limit_bytes=32 * 1024 * 1024),
        cost_estimate=pl.CostEstimate(flops=flops, transcendentals=trans,
                                      bytes_accessed=bytes_acc),
    )(*args)
    return logits.reshape(B, Lab)


if __name__ == "__main__":
    key = jax.random.PRNGKey(0)
    pkey, dkey = jax.random.split(key)
    params = init_params(pkey)

    B, S = 2, 16
    input_ids = jax.random.randint(dkey, (B, S), 0, CFG["vocab"], dtype=jnp.int32)

    logits = jax.jit(forward)(params, input_ids)
    jax.block_until_ready(logits)
    assert logits.shape == (B, CFG["labels"]) and logits.dtype == jnp.float32
    assert bool(jnp.all(jnp.isfinite(logits)))
    print("KERNEL_OK")
</pallas_src>

<mosaic_0001>
module attributes {stable_mosaic.version = 11 : i64} {
  func.func @_encoder_kernel(%arg0: i32, %arg1: i32, %arg2: memref<1x16x128xf32, #tpu.memory_space<vmem>>, %arg3: memref<1x128xf32, #tpu.memory_space<vmem>>, %arg4: memref<1x128xf32, #tpu.memory_space<vmem>>, %arg5: memref<1x128x384xbf16, #tpu.memory_space<vmem>>, %arg6: memref<1x1x384xf32, #tpu.memory_space<vmem>>, %arg7: memref<1x128x128xbf16, #tpu.memory_space<vmem>>, %arg8: memref<1x1x128xf32, #tpu.memory_space<vmem>>, %arg9: memref<1x1x128xf32, #tpu.memory_space<vmem>>, %arg10: memref<1x1x128xf32, #tpu.memory_space<vmem>>, %arg11: memref<1x128x256xbf16, #tpu.memory_space<vmem>>, %arg12: memref<1x1x256xf32, #tpu.memory_space<vmem>>, %arg13: memref<1x256x128xbf16, #tpu.memory_space<vmem>>, %arg14: memref<1x1x128xf32, #tpu.memory_space<vmem>>, %arg15: memref<1x1x128xf32, #tpu.memory_space<vmem>>, %arg16: memref<1x1x128xf32, #tpu.memory_space<vmem>>, %arg17: memref<128x128xbf16, #tpu.memory_space<vmem>>, %arg18: memref<1x128xf32, #tpu.memory_space<vmem>>, %arg19: memref<128x2xbf16, #tpu.memory_space<vmem>>, %arg20: memref<1x2xf32, #tpu.memory_space<vmem>>, %arg21: memref<1x1x2xf32, #tpu.memory_space<vmem>>, %arg22: memref<16x128xf32, #tpu.memory_space<vmem>>) attributes {dimension_semantics = [#tpu.dimension_semantics<parallel>, #tpu.dimension_semantics<arbitrary>], iteration_bounds = array<i64: 2, 2>, scalar_prefetch = 0 : i64, scratch_operands = 1 : i64, tpu.core_type = #tpu.core_type<tc>, window_params = [{transform_indices = @transform_0, window_bounds = array<i64: 1, 16, 128>}, {pipeline_mode = #tpu.pipeline_mode<synchronous>, transform_indices = @transform_1, window_bounds = array<i64: 1, 128>}, {pipeline_mode = #tpu.pipeline_mode<synchronous>, transform_indices = @transform_2, window_bounds = array<i64: 1, 128>}, {transform_indices = @transform_3, window_bounds = array<i64: 1, 128, 384>}, {transform_indices = @transform_4, window_bounds = array<i64: 1, 1, 384>}, {transform_indices = @transform_5, window_bounds = array<i64: 1, 128, 128>}, {transform_indices = @transform_6, window_bounds = array<i64: 1, 1, 128>}, {transform_indices = @transform_7, window_bounds = array<i64: 1, 1, 128>}, {transform_indices = @transform_8, window_bounds = array<i64: 1, 1, 128>}, {transform_indices = @transform_9, window_bounds = array<i64: 1, 128, 256>}, {transform_indices = @transform_10, window_bounds = array<i64: 1, 1, 256>}, {transform_indices = @transform_11, window_bounds = array<i64: 1, 256, 128>}, {transform_indices = @transform_12, window_bounds = array<i64: 1, 1, 128>}, {transform_indices = @transform_13, window_bounds = array<i64: 1, 1, 128>}, {transform_indices = @transform_14, window_bounds = array<i64: 1, 1, 128>}, {pipeline_mode = #tpu.pipeline_mode<synchronous>, transform_indices = @transform_15, window_bounds = array<i64: 128, 128>}, {pipeline_mode = #tpu.pipeline_mode<synchronous>, transform_indices = @transform_16, window_bounds = array<i64: 1, 128>}, {pipeline_mode = #tpu.pipeline_mode<synchronous>, transform_indices = @transform_17, window_bounds = array<i64: 128, 2>}, {pipeline_mode = #tpu.pipeline_mode<synchronous>, transform_indices = @transform_18, window_bounds = array<i64: 1, 2>}, {transform_indices = @transform_19, window_bounds = array<i64: 1, 1, 2>}]} {
    %c0_i32 = arith.constant 0 : i32
    %0 = arith.cmpi eq, %arg1, %c0_i32 : i32
    %1 = arith.extui %0 : i1 to i32
    %c0_i32_0 = arith.constant 0 : i32
    %2 = arith.cmpi ne, %1, %c0_i32_0 : i32
    scf.if %2 {
      %c0_78 = arith.constant 0 : index
      %c0_79 = arith.constant 0 : index
      %c0_80 = arith.constant 0 : index
      %177 = vector.load %arg2[%c0_78, %c0_79, %c0_80] : memref<1x16x128xf32, #tpu.memory_space<vmem>>, vector<1x16x128xf32>
      %178 = vector.shape_cast %177 : vector<1x16x128xf32> to vector<16x128xf32>
      %c0_81 = arith.constant 0 : index
      %c0_82 = arith.constant 0 : index
      %179 = vector.load %arg3[%c0_81, %c0_82] : memref<1x128xf32, #tpu.memory_space<vmem>>, vector<1x128xf32>
      %c0_83 = arith.constant 0 : index
      %c0_84 = arith.constant 0 : index
      %180 = vector.load %arg4[%c0_83, %c0_84] : memref<1x128xf32, #tpu.memory_space<vmem>>, vector<1x128xf32>
      %cst_85 = arith.constant dense<0.000000e+00> : vector<16xf32>
      %181 = vector.multi_reduction <add>, %178, %cst_85 [1] : vector<16x128xf32> to vector<16xf32>
      %182 = vector.shape_cast %181 : vector<16xf32> to vector<16x1xf32>
      %cst_86 = arith.constant 1.280000e+02 : f32
      %183 = vector.broadcast %cst_86 : f32 to vector<16x1xf32>
      %184 = arith.divf %182, %183 : vector<16x1xf32>
      %185 = vector.broadcast %184 : vector<16x1xf32> to vector<16x128xf32>
      %186 = arith.subf %178, %185 : vector<16x128xf32>
      %187 = arith.mulf %186, %186 : vector<16x128xf32>
      %cst_87 = arith.constant dense<0.000000e+00> : vector<16xf32>
      %188 = vector.multi_reduction <add>, %187, %cst_87 [1] : vector<16x128xf32> to vector<16xf32>
      %189 = vector.shape_cast %188 : vector<16xf32> to vector<16x1xf32>
      %cst_88 = arith.constant 1.280000e+02 : f32
      %190 = vector.broadcast %cst_88 : f32 to vector<16x1xf32>
      %191 = arith.divf %189, %190 : vector<16x1xf32>
      %cst_89 = arith.constant 9.99999996E-13 : f32
      %192 = vector.broadcast %cst_89 : f32 to vector<16x1xf32>
      %193 = arith.addf %191, %192 : vector<16x1xf32>
      %194 = math.rsqrt %193 : vector<16x1xf32>
      %195 = vector.broadcast %194 : vector<16x1xf32> to vector<16x128xf32>
      %196 = arith.mulf %186, %195 : vector<16x128xf32>
      %197 = vector.broadcast %179 : vector<1x128xf32> to vector<16x128xf32>
      %198 = arith.mulf %196, %197 : vector<16x128xf32>
      %199 = vector.broadcast %180 : vector<1x128xf32> to vector<16x128xf32>
      %200 = arith.addf %198, %199 : vector<16x128xf32>
      %c0_90 = arith.constant 0 : index
      %c0_91 = arith.constant 0 : index
      %201 = vector.load %arg22[%c0_90, %c0_91] : memref<16x128xf32, #tpu.memory_space<vmem>>, vector<16x128xf32>
      tpu.vector_store %arg22[%c0_90, %c0_91], %200 {strides = array<i32>} : memref<16x128xf32, #tpu.memory_space<vmem>>, vector<16x128xf32>,
    } else {
    }
    %c0 = arith.constant 0 : index
    %c0_1 = arith.constant 0 : index
    %3 = vector.load %arg22[%c0, %c0_1] : memref<16x128xf32, #tpu.memory_space<vmem>>, vector<16x128xf32>
    %4 = arith.truncf %3 : vector<16x128xf32> to vector<16x128xbf16>
    %c0_2 = arith.constant 0 : index
    %c0_3 = arith.constant 0 : index
    %c0_4 = arith.constant 0 : index
    %5 = vector.load %arg5[%c0_2, %c0_3, %c0_4] : memref<1x128x384xbf16, #tpu.memory_space<vmem>>, vector<1x128x384xbf16>
    %6 = vector.shape_cast %5 : vector<1x128x384xbf16> to vector<128x384xbf16>
    %cst = arith.constant dense<0.000000e+00> : vector<16x384xf32>
    %7 = tpu.matmul %4, %6, %cst {dimension_numbers = #tpu.dot_dimension_numbers<[1], [0], [0], [1], [0, 0, 1, 1], [], []>} : vector<16x128xbf16>, vector<128x384xbf16>, vector<16x384xf32> -> vector<16x384xf32>
    %c0_5 = arith.constant 0 : index
    %c0_6 = arith.constant 0 : index
    %c0_7 = arith.constant 0 : index
    %8 = vector.load %arg6[%c0_5, %c0_6, %c0_7] : memref<1x1x384xf32, #tpu.memory_space<vmem>>, vector<1x1x384xf32>
    %9 = vector.shape_cast %8 : vector<1x1x384xf32> to vector<1x384xf32>
    %10 = vector.broadcast %9 : vector<1x384xf32> to vector<16x384xf32>
    %11 = arith.addf %7, %10 : vector<16x384xf32>
    %12 = arith.truncf %11 : vector<16x384xf32> to vector<16x384xbf16>
    %13 = vector.extract_strided_slice %12 {offsets = [0, 0], sizes = [16, 32], strides = [1, 1]} : vector<16x384xbf16> to vector<16x32xbf16>
    %14 = vector.extract_strided_slice %12 {offsets = [0, 128], sizes = [16, 32], strides = [1, 1]} : vector<16x384xbf16> to vector<16x32xbf16>
    %15 = vector.extract_strided_slice %12 {offsets = [0, 256], sizes = [16, 32], strides = [1, 1]} : vector<16x384xbf16> to vector<16x32xbf16>
    %cst_8 = arith.constant dense<0.000000e+00> : vector<16x16xf32>
    %16 = tpu.matmul %13, %14, %cst_8 {dimension_numbers = #tpu.dot_dimension_numbers<[1], [1], [0], [0], [0, 0, 1, 0], [], []>} : vector<16x32xbf16>, vector<16x32xbf16>, vector<16x16xf32> -> vector<16x16xf32>
    %cst_9 = arith.constant 0.176776692 : f32
    %17 = vector.broadcast %cst_9 : f32 to vector<16x16xf32>
    %18 = arith.mulf %16, %17 : vector<16x16xf32>
    %cst_10 = arith.constant dense<0xFF800000> : vector<16xf32>
    %19 = vector.multi_reduction <maximumf>, %18, %cst_10 [1] : vector<16x16xf32> to vector<16xf32>
    %20 = vector.shape_cast %19 : vector<16xf32> to vector<16x1xf32>
    %21 = vector.broadcast %20 : vector<16x1xf32> to vector<16x16xf32>
    %22 = arith.subf %18, %21 : vector<16x16xf32>
    %23 = math.exp %22 : vector<16x16xf32>
    %cst_11 = arith.constant dense<0.000000e+00> : vector<16xf32>
    %24 = vector.multi_reduction <add>, %23, %cst_11 [1] : vector<16x16xf32> to vector<16xf32>
    %25 = vector.shape_cast %24 : vector<16xf32> to vector<16x1xf32>
    %26 = tpu.reciprocal %25 {approx = true} : vector<16x1xf32> -> vector<16x1xf32>
    %27 = vector.broadcast %26 : vector<16x1xf32> to vector<16x16xf32>
    %28 = arith.mulf %23, %27 : vector<16x16xf32>
    %29 = arith.truncf %28 : vector<16x16xf32> to vector<16x16xbf16>
    %cst_12 = arith.constant dense<0.000000e+00> : vector<16x32xf32>
    %30 = tpu.matmul %29, %15, %cst_12 {dimension_numbers = #tpu.dot_dimension_numbers<[1], [0], [0], [1], [0, 0, 1, 1], [], []>} : vector<16x16xbf16>, vector<16x32xbf16>, vector<16x32xf32> -> vector<16x32xf32>
    %31 = vector.extract_strided_slice %12 {offsets = [0, 32], sizes = [16, 32], strides = [1, 1]} : vector<16x384xbf16> to vector<16x32xbf16>
    %32 = vector.extract_strided_slice %12 {offsets = [0, 160], sizes = [16, 32], strides = [1, 1]} : vector<16x384xbf16> to vector<16x32xbf16>
    %33 = vector.extract_strided_slice %12 {offsets = [0, 288], sizes = [16, 32], strides = [1, 1]} : vector<16x384xbf16> to vector<16x32xbf16>
    %cst_13 = arith.constant dense<0.000000e+00> : vector<16x16xf32>
    %34 = tpu.matmul %31, %32, %cst_13 {dimension_numbers = #tpu.dot_dimension_numbers<[1], [1], [0], [0], [0, 0, 1, 0], [], []>} : vector<16x32xbf16>, vector<16x32xbf16>, vector<16x16xf32> -> vector<16x16xf32>
    %cst_14 = arith.constant 0.176776692 : f32
    %35 = vector.broadcast %cst_14 : f32 to vector<16x16xf32>
    %36 = arith.mulf %34, %35 : vector<16x16xf32>
    %cst_15 = arith.constant dense<0xFF800000> : vector<16xf32>
    %37 = vector.multi_reduction <maximumf>, %36, %cst_15 [1] : vector<16x16xf32> to vector<16xf32>
    %38 = vector.shape_cast %37 : vector<16xf32> to vector<16x1xf32>
    %39 = vector.broadcast %38 : vector<16x1xf32> to vector<16x16xf32>
    %40 = arith.subf %36, %39 : vector<16x16xf32>
    %41 = math.exp %40 : vector<16x16xf32>
    %cst_16 = arith.constant dense<0.000000e+00> : vector<16xf32>
    %42 = vector.multi_reduction <add>, %41, %cst_16 [1] : vector<16x16xf32> to vector<16xf32>
    %43 = vector.shape_cast %42 : vector<16xf32> to vector<16x1xf32>
    %44 = tpu.reciprocal %43 {approx = true} : vector<16x1xf32> -> vector<16x1xf32>
    %45 = vector.broadcast %44 : vector<16x1xf32> to vector<16x16xf32>
    %46 = arith.mulf %41, %45 : vector<16x16xf32>
    %47 = arith.truncf %46 : vector<16x16xf32> to vector<16x16xbf16>
    %cst_17 = arith.constant dense<0.000000e+00> : vector<16x32xf32>
    %48 = tpu.matmul %47, %33, %cst_17 {dimension_numbers = #tpu.dot_dimension_numbers<[1], [0], [0], [1], [0, 0, 1, 1], [], []>} : vector<16x16xbf16>, vector<16x32xbf16>, vector<16x32xf32> -> vector<16x32xf32>
    %49 = vector.extract_strided_slice %12 {offsets = [0, 64], sizes = [16, 32], strides = [1, 1]} : vector<16x384xbf16> to vector<16x32xbf16>
    %50 = vector.extract_strided_slice %12 {offsets = [0, 192], sizes = [16, 32], strides = [1, 1]} : vector<16x384xbf16> to vector<16x32xbf16>
    %51 = vector.extract_strided_slice %12 {offsets = [0, 320], sizes = [16, 32], strides = [1, 1]} : vector<16x384xbf16> to vector<16x32xbf16>
    %cst_18 = arith.constant dense<0.000000e+00> : vector<16x16xf32>
    %52 = tpu.matmul %49, %50, %cst_18 {dimension_numbers = #tpu.dot_dimension_numbers<[1], [1], [0], [0], [0, 0, 1, 0], [], []>} : vector<16x32xbf16>, vector<16x32xbf16>, vector<16x16xf32> -> vector<16x16xf32>
    %cst_19 = arith.constant 0.176776692 : f32
    %53 = vector.broadcast %cst_19 : f32 to vector<16x16xf32>
    %54 = arith.mulf %52, %53 : vector<16x16xf32>
    %cst_20 = arith.constant dense<0xFF800000> : vector<16xf32>
    %55 = vector.multi_reduction <maximumf>, %54, %cst_20 [1] : vector<16x16xf32> to vector<16xf32>
    %56 = vector.shape_cast %55 : vector<16xf32> to vector<16x1xf32>
    %57 = vector.broadcast %56 : vector<16x1xf32> to vector<16x16xf32>
    %58 = arith.subf %54, %57 : vector<16x16xf32>
    %59 = math.exp %58 : vector<16x16xf32>
    %cst_21 = arith.constant dense<0.000000e+00> : vector<16xf32>
    %60 = vector.multi_reduction <add>, %59, %cst_21 [1] : vector<16x16xf32> to vector<16xf32>
    %61 = vector.shape_cast %60 : vector<16xf32> to vector<16x1xf32>
    %62 = tpu.reciprocal %61 {approx = true} : vector<16x1xf32> -> vector<16x1xf32>
    %63 = vector.broadcast %62 : vector<16x1xf32> to vector<16x16xf32>
    %64 = arith.mulf %59, %63 : vector<16x16xf32>
    %65 = arith.truncf %64 : vector<16x16xf32> to vector<16x16xbf16>
    %cst_22 = arith.constant dense<0.000000e+00> : vector<16x32xf32>
    %66 = tpu.matmul %65, %51, %cst_22 {dimension_numbers = #tpu.dot_dimension_numbers<[1], [0], [0], [1], [0, 0, 1, 1], [], []>} : vector<16x16xbf16>, vector<16x32xbf16>, vector<16x32xf32> -> vector<16x32xf32>
    %67 = vector.extract_strided_slice %12 {offsets = [0, 96], sizes = [16, 32], strides = [1, 1]} : vector<16x384xbf16> to vector<16x32xbf16>
    %68 = vector.extract_strided_slice %12 {offsets = [0, 224], sizes = [16, 32], strides = [1, 1]} : vector<16x384xbf16> to vector<16x32xbf16>
    %69 = vector.extract_strided_slice %12 {offsets = [0, 352], sizes = [16, 32], strides = [1, 1]} : vector<16x384xbf16> to vector<16x32xbf16>
    %cst_23 = arith.constant dense<0.000000e+00> : vector<16x16xf32>
    %70 = tpu.matmul %67, %68, %cst_23 {dimension_numbers = #tpu.dot_dimension_numbers<[1], [1], [0], [0], [0, 0, 1, 0], [], []>} : vector<16x32xbf16>, vector<16x32xbf16>, vector<16x16xf32> -> vector<16x16xf32>
    %cst_24 = arith.constant 0.176776692 : f32
    %71 = vector.broadcast %cst_24 : f32 to vector<16x16xf32>
    %72 = arith.mulf %70, %71 : vector<16x16xf32>
    %cst_25 = arith.constant dense<0xFF800000> : vector<16xf32>
    %73 = vector.multi_reduction <maximumf>, %72, %cst_25 [1] : vector<16x16xf32> to vector<16xf32>
    %74 = vector.shape_cast %73 : vector<16xf32> to vector<16x1xf32>
    %75 = vector.broadcast %74 : vector<16x1xf32> to vector<16x16xf32>
    %76 = arith.subf %72, %75 : vector<16x16xf32>
    %77 = math.exp %76 : vector<16x16xf32>
    %cst_26 = arith.constant dense<0.000000e+00> : vector<16xf32>
    %78 = vector.multi_reduction <add>, %77, %cst_26 [1] : vector<16x16xf32> to vector<16xf32>
    %79 = vector.shape_cast %78 : vector<16xf32> to vector<16x1xf32>
    %80 = tpu.reciprocal %79 {approx = true} : vector<16x1xf32> -> vector<16x1xf32>
    %81 = vector.broadcast %80 : vector<16x1xf32> to vector<16x16xf32>
    %82 = arith.mulf %77, %81 : vector<16x16xf32>
    %83 = arith.truncf %82 : vector<16x16xf32> to vector<16x16xbf16>
    %cst_27 = arith.constant dense<0.000000e+00> : vector<16x32xf32>
    %84 = tpu.matmul %83, %69, %cst_27 {dimension_numbers = #tpu.dot_dimension_numbers<[1], [0], [0], [1], [0, 0, 1, 1], [], []>} : vector<16x16xbf16>, vector<16x32xbf16>, vector<16x32xf32> -> vector<16x32xf32>
    %85 = tpu.concatenate %30, %48, %66, %84 in 1 : vector<16x32xf32>, vector<16x32xf32>, vector<16x32xf32>, vector<16x32xf32> -> vector<16x128xf32>
    %86 = arith.truncf %85 : vector<16x128xf32> to vector<16x128xbf16>
    %c0_28 = arith.constant 0 : index
    %c0_29 = arith.constant 0 : index
    %c0_30 = arith.constant 0 : index
    %87 = vector.load %arg7[%c0_28, %c0_29, %c0_30] : memref<1x128x128xbf16, #tpu.memory_space<vmem>>, vector<1x128x128xbf16>
    %88 = vector.shape_cast %87 : vector<1x128x128xbf16> to vector<128x128xbf16>
    %cst_31 = arith.constant dense<0.000000e+00> : vector<16x128xf32>
    %89 = tpu.matmul %86, %88, %cst_31 {dimension_numbers = #tpu.dot_dimension_numbers<[1], [0], [0], [1], [0, 0, 1, 1], [], []>} : vector<16x128xbf16>, vector<128x128xbf16>, vector<16x128xf32> -> vector<16x128xf32>
    %c0_32 = arith.constant 0 : index
    %c0_33 = arith.constant 0 : index
    %c0_34 = arith.constant 0 : index
    %90 = vector.load %arg8[%c0_32, %c0_33, %c0_34] : memref<1x1x128xf32, #tpu.memory_space<vmem>>, vector<1x1x128xf32>
    %91 = vector.shape_cast %90 : vector<1x1x128xf32> to vector<1x128xf32>
    %92 = vector.broadcast %91 : vector<1x128xf32> to vector<16x128xf32>
    %93 = arith.addf %89, %92 : vector<16x128xf32>
    %94 = arith.addf %93, %3 : vector<16x128xf32>
    %c0_35 = arith.constant 0 : index
    %c0_36 = arith.constant 0 : index
    %c0_37 = arith.constant 0 : index
    %95 = vector.load %arg9[%c0_35, %c0_36, %c0_37] : memref<1x1x128xf32, #tpu.memory_space<vmem>>, vector<1x1x128xf32>
    %96 = vector.shape_cast %95 : vector<1x1x128xf32> to vector<1x128xf32>
    %c0_38 = arith.constant 0 : index
    %c0_39 = arith.constant 0 : index
    %c0_40 = arith.constant 0 : index
    %97 = vector.load %arg10[%c0_38, %c0_39, %c0_40] : memref<1x1x128xf32, #tpu.memory_space<vmem>>, vector<1x1x128xf32>
    %98 = vector.shape_cast %97 : vector<1x1x128xf32> to vector<1x128xf32>
    %cst_41 = arith.constant dense<0.000000e+00> : vector<16xf32>
    %99 = vector.multi_reduction <add>, %94, %cst_41 [1] : vector<16x128xf32> to vector<16xf32>
    %100 = vector.shape_cast %99 : vector<16xf32> to vector<16x1xf32>
    %cst_42 = arith.constant 1.280000e+02 : f32
    %101 = vector.broadcast %cst_42 : f32 to vector<16x1xf32>
    %102 = arith.divf %100, %101 : vector<16x1xf32>
    %103 = vector.broadcast %102 : vector<16x1xf32> to vector<16x128xf32>
    %104 = arith.subf %94, %103 : vector<16x128xf32>
    %105 = arith.mulf %104, %104 : vector<16x128xf32>
    %cst_43 = arith.constant dense<0.000000e+00> : vector<16xf32>
    %106 = vector.multi_reduction <add>, %105, %cst_43 [1] : vector<16x128xf32> to vector<16xf32>
    %107 = vector.shape_cast %106 : vector<16xf32> to vector<16x1xf32>
    %cst_44 = arith.constant 1.280000e+02 : f32
    %108 = vector.broadcast %cst_44 : f32 to vector<16x1xf32>
    %109 = arith.divf %107, %108 : vector<16x1xf32>
    %cst_45 = arith.constant 9.99999996E-13 : f32
    %110 = vector.broadcast %cst_45 : f32 to vector<16x1xf32>
    %111 = arith.addf %109, %110 : vector<16x1xf32>
    %112 = math.rsqrt %111 : vector<16x1xf32>
    %113 = vector.broadcast %112 : vector<16x1xf32> to vector<16x128xf32>
    %114 = arith.mulf %104, %113 : vector<16x128xf32>
    %115 = vector.broadcast %96 : vector<1x128xf32> to vector<16x128xf32>
    %116 = arith.mulf %114, %115 : vector<16x128xf32>
    %117 = vector.broadcast %98 : vector<1x128xf32> to vector<16x128xf32>
    %118 = arith.addf %116, %117 : vector<16x128xf32>
    %119 = arith.truncf %118 : vector<16x128xf32> to vector<16x128xbf16>
    %c0_46 = arith.constant 0 : index
    %c0_47 = arith.constant 0 : index
    %c0_48 = arith.constant 0 : index
    %120 = vector.load %arg11[%c0_46, %c0_47, %c0_48] : memref<1x128x256xbf16, #tpu.memory_space<vmem>>, vector<1x128x256xbf16>
    %121 = vector.shape_cast %120 : vector<1x128x256xbf16> to vector<128x256xbf16>
    %cst_49 = arith.constant dense<0.000000e+00> : vector<16x256xf32>
    %122 = tpu.matmul %119, %121, %cst_49 {dimension_numbers = #tpu.dot_dimension_numbers<[1], [0], [0], [1], [0, 0, 1, 1], [], []>} : vector<16x128xbf16>, vector<128x256xbf16>, vector<16x256xf32> -> vector<16x256xf32>
    %c0_50 = arith.constant 0 : index
    %c0_51 = arith.constant 0 : index
    %c0_52 = arith.constant 0 : index
    %123 = vector.load %arg12[%c0_50, %c0_51, %c0_52] : memref<1x1x256xf32, #tpu.memory_space<vmem>>, vector<1x1x256xf32>
    %124 = vector.shape_cast %123 : vector<1x1x256xf32> to vector<1x256xf32>
    %125 = vector.broadcast %124 : vector<1x256xf32> to vector<16x256xf32>
    %126 = arith.addf %122, %125 : vector<16x256xf32>
    %127 = arith.mulf %126, %126 : vector<16x256xf32>
    %128 = arith.mulf %126, %127 : vector<16x256xf32>
    %cst_53 = arith.constant 4.471500e-02 : f32
    %129 = vector.broadcast %cst_53 : f32 to vector<16x256xf32>
    %130 = arith.mulf %129, %128 : vector<16x256xf32>
    %131 = arith.addf %126, %130 : vector<16x256xf32>
    %cst_54 = arith.constant 0.797884583 : f32
    %132 = vector.broadcast %cst_54 : f32 to vector<16x256xf32>
    %133 = arith.mulf %132, %131 : vector<16x256xf32>
    %134 = math.tanh %133 : vector<16x256xf32>
    %cst_55 = arith.constant 1.000000e+00 : f32
    %135 = vector.broadcast %cst_55 : f32 to vector<16x256xf32>
    %136 = arith.addf %135, %134 : vector<16x256xf32>
    %cst_56 = arith.constant 5.000000e-01 : f32
    %137 = vector.broadcast %cst_56 : f32 to vector<16x256xf32>
    %138 = arith.mulf %137, %136 : vector<16x256xf32>
    %139 = arith.mulf %126, %138 : vector<16x256xf32>
    %140 = arith.truncf %139 : vector<16x256xf32> to vector<16x256xbf16>
    %c0_57 = arith.constant 0 : index
    %c0_58 = arith.constant 0 : index
    %c0_59 = arith.constant 0 : index
    %141 = vector.load %arg13[%c0_57, %c0_58, %c0_59] : memref<1x256x128xbf16, #tpu.memory_space<vmem>>, vector<1x256x128xbf16>
    %142 = vector.shape_cast %141 : vector<1x256x128xbf16> to vector<256x128xbf16>
    %cst_60 = arith.constant dense<0.000000e+00> : vector<16x128xf32>
    %143 = tpu.matmul %140, %142, %cst_60 {dimension_numbers = #tpu.dot_dimension_numbers<[1], [0], [0], [1], [0, 0, 1, 1], [], []>} : vector<16x256xbf16>, vector<256x128xbf16>, vector<16x128xf32> -> vector<16x128xf32>
    %c0_61 = arith.constant 0 : index
    %c0_62 = arith.constant 0 : index
    %c0_63 = arith.constant 0 : index
    %144 = vector.load %arg14[%c0_61, %c0_62, %c0_63] : memref<1x1x128xf32, #tpu.memory_space<vmem>>, vector<1x1x128xf32>
    %145 = vector.shape_cast %144 : vector<1x1x128xf32> to vector<1x128xf32>
    %146 = vector.broadcast %145 : vector<1x128xf32> to vector<16x128xf32>
    %147 = arith.addf %143, %146 : vector<16x128xf32>
    %148 = arith.addf %147, %118 : vector<16x128xf32>
    %c0_64 = arith.constant 0 : index
    %c0_65 = arith.constant 0 : index
    %c0_66 = arith.constant 0 : index
    %149 = vector.load %arg15[%c0_64, %c0_65, %c0_66] : memref<1x1x128xf32, #tpu.memory_space<vmem>>, vector<1x1x128xf32>
    %150 = vector.shape_cast %149 : vector<1x1x128xf32> to vector<1x128xf32>
    %c0_67 = arith.constant 0 : index
    %c0_68 = arith.constant 0 : index
    %c0_69 = arith.constant 0 : index
    %151 = vector.load %arg16[%c0_67, %c0_68, %c0_69] : memref<1x1x128xf32, #tpu.memory_space<vmem>>, vector<1x1x128xf32>
    %152 = vector.shape_cast %151 : vector<1x1x128xf32> to vector<1x128xf32>
    %cst_70 = arith.constant dense<0.000000e+00> : vector<16xf32>
    %153 = vector.multi_reduction <add>, %148, %cst_70 [1] : vector<16x128xf32> to vector<16xf32>
    %154 = vector.shape_cast %153 : vector<16xf32> to vector<16x1xf32>
    %cst_71 = arith.constant 1.280000e+02 : f32
    %155 = vector.broadcast %cst_71 : f32 to vector<16x1xf32>
    %156 = arith.divf %154, %155 : vector<16x1xf32>
    %157 = vector.broadcast %156 : vector<16x1xf32> to vector<16x128xf32>
    %158 = arith.subf %148, %157 : vector<16x128xf32>
    %159 = arith.mulf %158, %158 : vector<16x128xf32>
    %cst_72 = arith.constant dense<0.000000e+00> : vector<16xf32>
    %160 = vector.multi_reduction <add>, %159, %cst_72 [1] : vector<16x128xf32> to vector<16xf32>
    %161 = vector.shape_cast %160 : vector<16xf32> to vector<16x1xf32>
    %cst_73 = arith.constant 1.280000e+02 : f32
    %162 = vector.broadcast %cst_73 : f32 to vector<16x1xf32>
    %163 = arith.divf %161, %162 : vector<16x1xf32>
    %cst_74 = arith.constant 9.99999996E-13 : f32
    %164 = vector.broadcast %cst_74 : f32 to vector<16x1xf32>
    %165 = arith.addf %163, %164 : vector<16x1xf32>
    %166 = math.rsqrt %165 : vector<16x1xf32>
    %167 = vector.broadcast %166 : vector<16x1xf32> to vector<16x128xf32>
    %168 = arith.mulf %158, %167 : vector<16x128xf32>
    %169 = vector.broadcast %150 : vector<1x128xf32> to vector<16x128xf32>
    %170 = arith.mulf %168, %169 : vector<16x128xf32>
    %171 = vector.broadcast %152 : vector<1x128xf32> to vector<16x128xf32>
    %172 = arith.addf %170, %171 : vector<16x128xf32>
    %c0_75 = arith.constant 0 : index
    %c0_76 = arith.constant 0 : index
    %173 = vector.load %arg22[%c0_75, %c0_76] : memref<16x128xf32, #tpu.memory_space<vmem>>, vector<16x128xf32>
    tpu.vector_store %arg22[%c0_75, %c0_76], %172 {strides = array<i32>} : memref<16x128xf32, #tpu.memory_space<vmem>>, vector<16x128xf32>,
    %c1_i32 = arith.constant 1 : i32
    %174 = arith.cmpi eq, %arg1, %c1_i32 : i32
    %175 = arith.extui %174 : i1 to i32
    %c0_i32_77 = arith.constant 0 : i32
    %176 = arith.cmpi ne, %175, %c0_i32_77 : i32
    scf.if %176 {
      %177 = vector.extract_strided_slice %172 {offsets = [0, 0], sizes = [1, 128], strides = [1, 1]} : vector<16x128xf32> to vector<1x128xf32>
      %178 = arith.truncf %177 : vector<1x128xf32> to vector<1x128xbf16>
      %c0_78 = arith.constant 0 : index
      %c0_79 = arith.constant 0 : index
      %179 = vector.load %arg17[%c0_78, %c0_79] : memref<128x128xbf16, #tpu.memory_space<vmem>>, vector<128x128xbf16>
      %cst_80 = arith.constant dense<0.000000e+00> : vector<1x128xf32>
      %180 = tpu.matmul %178, %179, %cst_80 {dimension_numbers = #tpu.dot_dimension_numbers<[1], [0], [0], [1], [0, 0, 1, 1], [], []>} : vector<1x128xbf16>, vector<128x128xbf16>, vector<1x128xf32> -> vector<1x128xf32>
      %c0_81 = arith.constant 0 : index
      %c0_82 = arith.constant 0 : index
      %181 = vector.load %arg18[%c0_81, %c0_82] : memref<1x128xf32, #tpu.memory_space<vmem>>, vector<1x128xf32>
      %182 = arith.addf %180, %181 : vector<1x128xf32>
      %183 = math.tanh %182 : vector<1x128xf32>
      %184 = arith.truncf %183 : vector<1x128xf32> to vector<1x128xbf16>
      %c0_83 = arith.constant 0 : index
      %c0_84 = arith.constant 0 : index
      %185 = vector.load %arg19[%c0_83, %c0_84] : memref<128x2xbf16, #tpu.memory_space<vmem>>, vector<128x2xbf16>
      %cst_85 = arith.constant dense<0.000000e+00> : vector<1x2xf32>
      %186 = tpu.matmul %184, %185, %cst_85 {dimension_numbers = #tpu.dot_dimension_numbers<[1], [0], [0], [1], [0, 0, 1, 1], [], []>} : vector<1x128xbf16>, vector<128x2xbf16>, vector<1x2xf32> -> vector<1x2xf32>
      %c0_86 = arith.constant 0 : index
      %c0_87 = arith.constant 0 : index
      %187 = vector.load %arg20[%c0_86, %c0_87] : memref<1x2xf32, #tpu.memory_space<vmem>>, vector<1x2xf32>
      %188 = arith.addf %186, %187 : vector<1x2xf32>
      %189 = vector.shape_cast %188 : vector<1x2xf32> to vector<1x1x2xf32>
      %c0_88 = arith.constant 0 : index
      %c0_89 = arith.constant 0 : index
      %c0_90 = arith.constant 0 : index
      %190 = vector.load %arg21[%c0_88, %c0_89, %c0_90] : memref<1x1x2xf32, #tpu.memory_space<vmem>>, vector<1x1x2xf32>
      tpu.vector_store %arg21[%c0_88, %c0_89, %c0_90], %189 {strides = array<i32>} : memref<1x1x2xf32, #tpu.memory_space<vmem>>, vector<1x1x2xf32>,
    } else {
    }
    return
  }
  func.func @transform_0(%arg0: i32, %arg1: i32) -> (i32, i32, i32) {
    %c0_i32 = arith.constant 0 : i32
    %c0_i32_0 = arith.constant 0 : i32
    %c0_i32_1 = arith.constant 0 : i32
    return %arg0, %c0_i32, %c0_i32_0 : i32, i32, i32
  }
  func.func @transform_1(%arg0: i32, %arg1: i32) -> (i32, i32) {
    %c0_i32 = arith.constant 0 : i32
    %c0_i32_0 = arith.constant 0 : i32
    %c0_i32_1 = arith.constant 0 : i32
    return %c0_i32, %c0_i32_0 : i32, i32
  }
  func.func @transform_2(%arg0: i32, %arg1: i32) -> (i32, i32) {
    %c0_i32 = arith.constant 0 : i32
    %c0_i32_0 = arith.constant 0 : i32
    %c0_i32_1 = arith.constant 0 : i32
    return %c0_i32, %c0_i32_0 : i32, i32
  }
  func.func @transform_3(%arg0: i32, %arg1: i32) -> (i32, i32, i32) {
    %c0_i32 = arith.constant 0 : i32
    %c0_i32_0 = arith.constant 0 : i32
    %c0_i32_1 = arith.constant 0 : i32
    return %arg1, %c0_i32, %c0_i32_0 : i32, i32, i32
  }
  func.func @transform_4(%arg0: i32, %arg1: i32) -> (i32, i32, i32) {
    %c0_i32 = arith.constant 0 : i32
    %c0_i32_0 = arith.constant 0 : i32
    %c0_i32_1 = arith.constant 0 : i32
    return %arg1, %c0_i32, %c0_i32_0 : i32, i32, i32
  }
  func.func @transform_5(%arg0: i32, %arg1: i32) -> (i32, i32, i32) {
    %c0_i32 = arith.constant 0 : i32
    %c0_i32_0 = arith.constant 0 : i32
    %c0_i32_1 = arith.constant 0 : i32
    return %arg1, %c0_i32, %c0_i32_0 : i32, i32, i32
  }
  func.func @transform_6(%arg0: i32, %arg1: i32) -> (i32, i32, i32) {
    %c0_i32 = arith.constant 0 : i32
    %c0_i32_0 = arith.constant 0 : i32
    %c0_i32_1 = arith.constant 0 : i32
    return %arg1, %c0_i32, %c0_i32_0 : i32, i32, i32
  }
  func.func @transform_7(%arg0: i32, %arg1: i32) -> (i32, i32, i32) {
    %c0_i32 = arith.constant 0 : i32
    %c0_i32_0 = arith.constant 0 : i32
    %c0_i32_1 = arith.constant 0 : i32
    return %arg1, %c0_i32, %c0_i32_0 : i32, i32, i32
  }
  func.func @transform_8(%arg0: i32, %arg1: i32) -> (i32, i32, i32) {
    %c0_i32 = arith.constant 0 : i32
    %c0_i32_0 = arith.constant 0 : i32
    %c0_i32_1 = arith.constant 0 : i32
    return %arg1, %c0_i32, %c0_i32_0 : i32, i32, i32
  }
  func.func @transform_9(%arg0: i32, %arg1: i32) -> (i32, i32, i32) {
    %c0_i32 = arith.constant 0 : i32
    %c0_i32_0 = arith.constant 0 : i32
    %c0_i32_1 = arith.constant 0 : i32
    return %arg1, %c0_i32, %c0_i32_0 : i32, i32, i32
  }
  func.func @transform_10(%arg0: i32, %arg1: i32) -> (i32, i32, i32) {
    %c0_i32 = arith.constant 0 : i32
    %c0_i32_0 = arith.constant 0 : i32
    %c0_i32_1 = arith.constant 0 : i32
    return %arg1, %c0_i32, %c0_i32_0 : i32, i32, i32
  }
  func.func @transform_11(%arg0: i32, %arg1: i32) -> (i32, i32, i32) {
    %c0_i32 = arith.constant 0 : i32
    %c0_i32_0 = arith.constant 0 : i32
    %c0_i32_1 = arith.constant 0 : i32
    return %arg1, %c0_i32, %c0_i32_0 : i32, i32, i32
  }
  func.func @transform_12(%arg0: i32, %arg1: i32) -> (i32, i32, i32) {
    %c0_i32 = arith.constant 0 : i32
    %c0_i32_0 = arith.constant 0 : i32
    %c0_i32_1 = arith.constant 0 : i32
    return %arg1, %c0_i32, %c0_i32_0 : i32, i32, i32
  }
  func.func @transform_13(%arg0: i32, %arg1: i32) -> (i32, i32, i32) {
    %c0_i32 = arith.constant 0 : i32
    %c0_i32_0 = arith.constant 0 : i32
    %c0_i32_1 = arith.constant 0 : i32
    return %arg1, %c0_i32, %c0_i32_0 : i32, i32, i32
  }
  func.func @transform_14(%arg0: i32, %arg1: i32) -> (i32, i32, i32) {
    %c0_i32 = arith.constant 0 : i32
    %c0_i32_0 = arith.constant 0 : i32
    %c0_i32_1 = arith.constant 0 : i32
    return %arg1, %c0_i32, %c0_i32_0 : i32, i32, i32
  }
  func.func @transform_15(%arg0: i32, %arg1: i32) -> (i32, i32) {
    %c0_i32 = arith.constant 0 : i32
    %c0_i32_0 = arith.constant 0 : i32
    %c0_i32_1 = arith.constant 0 : i32
    return %c0_i32, %c0_i32_0 : i32, i32
  }
  func.func @transform_16(%arg0: i32, %arg1: i32) -> (i32, i32) {
    %c0_i32 = arith.constant 0 : i32
    %c0_i32_0 = arith.constant 0 : i32
    %c0_i32_1 = arith.constant 0 : i32
    return %c0_i32, %c0_i32_0 : i32, i32
  }
  func.func @transform_17(%arg0: i32, %arg1: i32) -> (i32, i32) {
    %c0_i32 = arith.constant 0 : i32
    %c0_i32_0 = arith.constant 0 : i32
    %c0_i32_1 = arith.constant 0 : i32
    return %c0_i32, %c0_i32_0 : i32, i32
  }
  func.func @transform_18(%arg0: i32, %arg1: i32) -> (i32, i32) {
    %c0_i32 = arith.constant 0 : i32
    %c0_i32_0 = arith.constant 0 : i32
    %c0_i32_1 = arith.constant 0 : i32
    return %c0_i32, %c0_i32_0 : i32, i32
  }
  func.func @transform_19(%arg0: i32, %arg1: i32) -> (i32, i32, i32) {
    %c0_i32 = arith.constant 0 : i32
    %c0_i32_0 = arith.constant 0 : i32
    %c0_i32_1 = arith.constant 0 : i32
    return %arg0, %c0_i32, %c0_i32_0 : i32, i32, i32
  }
}

</mosaic_0001>

<bundles_post_ra>
// kernel: forward.1
= control target key start
LH: loop header
LB: loop body
LE: loop exit
PB: predicated region body
PF: predicated region fallthrough
CT: control target
= control target key end

     0   :  { %s4873_s0 = inlined_call_operand.vmem [shape: f32[2,16,128], index: 0, kind: input, shape index: {}]   ;;  %s4874_s1 = inlined_call_operand.hbm [shape: f32[1,128], index: 1, kind: input, shape index: {}]   ;;  %s4875_s2 = inlined_call_operand.hbm [shape: f32[1,128], index: 2, kind: input, shape index: {}]   ;;  %s4876_s3 = inlined_call_operand.vmem [shape: bf16[2,128,384], index: 3, kind: input, shape index: {}]   ;;  %s4877_s4 = inlined_call_operand.vmem [shape: f32[2,1,384], index: 4, kind: input, shape index: {}]   ;;  %s4878_s5 = inlined_call_operand.vmem [shape: bf16[2,128,128], index: 5, kind: input, shape index: {}]   ;;  %s4879_s6 = inlined_call_operand.vmem [shape: f32[2,1,128], index: 6, kind: input, shape index: {}]   ;;  %s4880_s7 = inlined_call_operand.hbm [shape: f32[2,1,128], index: 7, kind: input, shape index: {}]   ;;  %s4881_s8 = inlined_call_operand.hbm [shape: f32[2,1,128], index: 8, kind: input, shape index: {}]   ;;  %s4882_s9 = inlined_call_operand.hbm [shape: bf16[2,128,256], index: 9, kind: input, shape index: {}]   ;;  %s4883_s10 = inlined_call_operand.vmem [shape: f32[2,1,256], index: 10, kind: input, shape index: {}]   ;;  %s4884_s11 = inlined_call_operand.hbm [shape: bf16[2,256,128], index: 11, kind: input, shape index: {}]   ;;  %s4885_s12 = inlined_call_operand.hbm [shape: f32[2,1,128], index: 12, kind: input, shape index: {}]   ;;  %s4886_s13 = inlined_call_operand.hbm [shape: f32[2,1,128], index: 13, kind: input, shape index: {}]   ;;  %s4887_s14 = inlined_call_operand.hbm [shape: f32[2,1,128], index: 14, kind: input, shape index: {}]   ;;  %s4888_s15 = inlined_call_operand.hbm [shape: bf16[128,128], index: 15, kind: input, shape index: {}]   ;;  %s4889_s16 = inlined_call_operand.hbm [shape: f32[1,128], index: 16, kind: input, shape index: {}]   ;;  %s4890_s17 = inlined_call_operand.vmem [shape: bf16[128,2], index: 17, kind: input, shape index: {}]   ;;  %s4891_s18 = inlined_call_operand.hbm [shape: f32[1,2], index: 18, kind: input, shape index: {}]   ;;  %s4892_s19 = inlined_call_operand.hbm [shape: f32[2,1,2], index: 19, kind: output, shape index: {}]  }
   0x1   :  { %4920 = sst [smem:[#allocation45_spill]] %s4873_s0 }
   0x2   :  { %4921 = sst [smem:[#allocation46_spill]] %s4874_s1 }
   0x3   :  { %4922 = sst [smem:[#allocation47_spill]] %s4875_s2 }
   0x4   :  { %4923 = sst [smem:[#allocation48_spill]] %s4876_s3 }
   0x5   :  { %4924 = sst [smem:[#allocation49_spill]] %s4877_s4 }
   0x6   :  { %4925 = sst [smem:[#allocation50_spill]] %s4878_s5 }
   0x7   :  { %4926 = sst [smem:[#allocation51_spill]] %s4879_s6 }
   0x8   :  { %4927 = sst [smem:[#allocation52_spill]] %s4880_s7 }
   0x9   :  { %4928 = sst [smem:[#allocation53_spill]] %s4881_s8 }
   0xa   :  { %4929 = sst [smem:[#allocation54_spill]] %s4882_s9 }
   0xb   :  { %4930 = sst [smem:[#allocation55_spill]] %s4883_s10 }
   0xc   :  { %4931 = sst [smem:[#allocation56_spill]] %s4884_s11 }
   0xd   :  { %4932 = sst [smem:[#allocation57_spill]] %s4885_s12 }
   0xe   :  { %4933 = sst [smem:[#allocation58_spill]] %s4886_s13 }
   0xf   :  { %4934 = sst [smem:[#allocation59_spill]] %s4887_s14 }
  0x10   :  { %4935 = sst [smem:[#allocation60_spill]] %s4888_s15 }
  0x11   :  { %4936 = sst [smem:[#allocation61_spill]] %s4890_s17 }
  0x12   :  { %4937 = sst [smem:[#allocation62_spill]] %s4892_s19 }
  0x13   :  { %24 = vsyncpa [#allocation4], 0 }
  0x14   :  { %25 = vsyncpa [#allocation7], 0 }
  0x15   :  { %26 = vsyncpa [#allocation17], 0 }
  0x16   :  { %27 = vsyncpa [#allocation5], 0 }
  0x17   :  { %29 = vsyncpa [#allocation5 + $0x1], 0  ;;  %s4221_s0 = smov 0   ;;  %s4223_s30 = smov 0  }
  0x18   :  { %s4225_s20 = smov 0   ;;  %s4227_s21 = smov 0  }
  0x19   :  { %s4229_s1 = smov 0   ;;  %s4231_s22 = smov 0  }
  0x1a   :  { %s4233_s2 = smov 0   ;;  %s4235_s23 = smov 0  }
  0x1b   :  { %s4237_s24 = smov 0   ;;  %s4239_s25 = smov 0  }
  0x1c   :  { %s4241_s3 = smov 0  }
  0x1d LB: > { %4938 = sst [smem:[#allocation26_spill]] %s4054_s0  ;;  %s4275_s26 = sadd.s32 4294967295, %s4094_s3   ;;  %s4094_s3 = sphi %s4241_s3, %s35_s3   ;;  %s4090_s25 = sphi %s4239_s25, %s5028_s25   ;;  %s4086_s24 = sphi %s4237_s24, %s5027_s24   ;;  %s4082_s23 = sphi %s4235_s23, %s5026_s23   ;;  %s4078_s2 = sphi %s4233_s2, %s5025_s2   ;;  %s4074_s22 = sphi %s4231_s22, %s5024_s22   ;;  %s4070_s1 = sphi %s4229_s1, %s5023_s1   ;;  %s4066_s21 = sphi %s4227_s21, %s5022_s21   ;;  %s4062_s20 = sphi %s4225_s20, %s5021_s20   ;;  %s4058_s30 = sphi %s4223_s30, %s5020_s30   ;;  %s4054_s0 = sphi %s4221_s0, %s5019_s0  }
  0x1e   : > { %4939 = sst [smem:[#allocation27_spill]] %s4058_s30  ;;  %s2930_s27 = sadd.s32 4294967294, %s4094_s3  }
  0x1f   : > { %4940 = sst [smem:[#allocation28_spill]] %s4062_s20  ;;  %p239_p0 = scmp.ne.s32.totalorder %s4070_s1, %s4066_s21 }
  0x20   : > { %4941 = sst [smem:[#allocation29_spill]] %s4070_s1  ;;  %p4900_p1 = scmp.eq.s32.totalorder %s4275_s26, 0 }
  0x21   : > { %4942 = sst [smem:[#allocation30_spill]] %s4074_s22  ;;  %p528_p2 = scmp.ne.s32.totalorder %s4062_s20, %s4058_s30 }
  0x22   : > { %4943 = sst [smem:[#allocation31_spill]] %s4078_s2  ;;  %p4285_p3 = por %p4900_p1, %p239_p0 }
  0x23   : > { %4944 = sst [smem:[#allocation32_spill]] %s4082_s23  ;;  %p529_p4 = scmp.eq.s32.totalorder %s4275_s26, 3 }
  0x24   : > { %4945 = sst [smem:[#allocation33_spill]] %s4086_s24  ;;  %p534_p5 = scmp.ne.s32.totalorder %s4058_s30, %s4054_s0 }
  0x25   : > { %4946 = sst [smem:[#allocation34_spill]] %s4090_s25  ;;  %p535_p6 = scmp.eq.s32.totalorder %s2930_s27, 3 }
  0x26   : > { %4947 = sst [smem:[#allocation35_spill]] %s4094_s3  ;;  %p4292_p7 = por %p529_p4, %p528_p2 }
  0x27   : > { %4948 = sst [smem:[#allocation36_spill]] %s4275_s26  ;;  %p2931_p8 = scmp.ge.s32.totalorder %s4094_s3, 1 }
  0x28   : > { %s4949_s29 = scalar_select %p4285_p3, 1, 0 }
  0x29   : > { %s4951_s19 = scalar_select %p4292_p7, 1, 0 }
  0x2a   : > { %4950 = sst [smem:[#allocation37_spill]] %s4949_s29  ;;  %p4297_p9 = por %p535_p6, %p534_p5 }
  0x2b   : > { %4952 = sst [smem:[#allocation38_spill]] %s4951_s19  ;;  %p542_p10 = scmp.lt.s32.totalorder %s4094_s3, 5 }
  0x2c   : > { %s4953_s21 = scalar_select %p4297_p9, 1, 0 }
  0x2d   : > { %p4302_p11 = pnand %p2931_p8, %p542_p10  ;;  %s4096_s17 = smov [#allocation3]  }
  0x2e   : > { %4954 = sst [smem:[#allocation39_spill]] %s4953_s21  ;;  %s555_s10 = sshll.u32 %s4096_s17, 4  ;;  %s556_s10 = int_to_ptr.vmem [resolvable:$true] %s555_s10 }
  0x2f   : > { %s4955_s28 = scalar_select %p4302_p11, 1, 0 }
  0x30   : > { %p3308_p12 = pneg %p4302_p11  ;;  %s44_s0 = sadd.s32 1, %s4086_s24 }
  0x31   : > { %4956 = sst [smem:[#allocation40_spill]] %s4955_s28  ;;  %s3643_s19 = scalar_lea.vmem %s556_s10, 16 }
  0x32   : > { %p4310_p13 = pnand %p3308_p12, %p4900_p1  ;;  %p3644_p2 = scmp.ne.s32.totalorder %s556_s10, %s3643_s19 }
  0x33   : > { %s3650_s17 = scalar_lea.vmem %s556_s10, 32  ;;  %p3651_p6 = scmp.lt.s32.totalorder %s556_s10, %s556_s10 }
  0x34   : > { %p4317_p0 = pneg %p4310_p13  ;;  %p3652_p8 = scmp.lt.s32.totalorder %s3650_s17, %s3643_s19 }
  0x36   : > { %p3646_p4 = pnand %p3644_p2, %p4317_p0  ;;  %p3653_p10 = por %p3652_p8, %p3651_p6 }
  0x38   : > { %p3647_p5 = pneg %p3646_p4 }
  0x3a   : > { %p3654_p12 = pnand %p3653_p10, %p3647_p5 }
  0x3c   : > { %3657 = shalt.err (!%p3654_p12)
}
  0x3d   : > { %s4959_s5 = sld [smem:[#allocation46_spill]]  ;;  %p45_p2 = scmp.ge.s32.totalorder %s44_s0, 2 }
  0x3e   : > { %s47_s19 = sadd.s32 1, %s4090_s25  ;;  %s226_s17 = sadd.s32 1, %s4074_s22 }
  0x3f   : > { %p233_p4 = scmp.ne.s32.totalorder %s4074_s22, %s4070_s1  ;;  %s5030_s0 = smov (%p45_p2, %s44_s0), 0 }
  0x40   : > { %4960 = sst [smem:[#allocation41_spill]] %s5030_s0  ;;  %s5032_s19 = smov (!%p45_p2, %s47_s19), %s4090_s25 }
  0x41   : > { %s223_s4 = ssub.s32 %s4086_s24, %s5030_s0  ;;  %p234_p5 = scmp.eq.s32.totalorder %s4094_s3, 0 }
  0x42   : > { %p49_p6 = scmp.ge.s32.totalorder %s5032_s19, 2  ;;  %p224_p8 = scmp.eq.s32.totalorder %s223_s4, 0 }
  0x43   : > { %3311 = dma.hbm_to_vmem [thread:$0]  (!%p4310_p13), %s4959_s5, 16, %s556_s10, [#allocation4]  }
  0x44   : > { %p4338_p10 = por %p234_p5, %p233_p4  ;;  %p3355_p12 = scmp.lt.s32.totalorder %s4094_s3, 4 }
  0x45   : > { %s5034_s19 = smov (%p49_p6, %s5032_s19), 0  ;;  %s652_s2 = sand.u32 1, %s4094_s3  }
  0x46   : > { %4962 = sst [smem:[#allocation42_spill]] %s5034_s19  ;;  %s515_s10 = ssub.s32 %s4090_s25, %s5034_s19 }
  0x47   : > { %s4346_s5 = scalar_select %p224_p8, %s4074_s22, %s226_s17  }
  0x48   : > { %p516_p1 = scmp.eq.s32.totalorder %s515_s10, 0  ;;  %s4352_s23 = sand.u32 1, %s4074_s22  }
  0x49   : > { %4963 = sst [smem:[#allocation43_spill]] %s4346_s5  ;;  %s4355_s0 = sshll.u32 %s4086_s24, 4 }
  0x4a   : > { %s4964_s4 = sadd.s32 1, %s4062_s20  ;;  %s4966_s7 = sld [smem:[#allocation52_spill]] }
  0x4b   : > { %s4360_s30 = scalar_select %p516_p1, %s4062_s20, %s4964_s4  }
  0x4c   : > { %s655_s28 = scalar_lea.vmem [#allocation8], %s4352_s23  ;;  %p4369_p2 = pnand %p3355_p12, %p4338_p10 }
  0x4d   : > { %4965 = sst [smem:[#allocation44_spill]] %s4360_s30  ;;  %s662_s17 = sshll.u32 %s655_s28, 4  ;;  %s663_s17 = int_to_ptr.vmem [resolvable:$true] %s662_s17 }
  0x4e   : > { %s4968_s8 = sld [smem:[#allocation53_spill]]  ;;  %s4377_s22 = scalar_lea.sflag [#allocation4], %s652_s2 }
  0x4f   : > { %p4381_p1 = pneg %p4369_p2  ;;  %s3671_s1 = scalar_lea.vmem %s663_s17, 16 }
  0x50   : > { %s660_s26 = scalar_lea.hbm %s4966_s7, %s4355_s0  ;;  %p3672_p4 = scmp.ne.s32.totalorder %s663_s17, %s3671_s1 }
  0x51   : > { %s4097_s28 = smov [#allocation8]  }
  0x52   : > { %p3674_p5 = pnand %p3672_p4, %p4381_p1  ;;  %s3676_s29 = sshll.u32 %s4097_s28, 4  ;;  %s3677_s29 = int_to_ptr.vmem [resolvable:$false] %s3676_s29 }
  0x53   : > { %s3678_s6 = scalar_lea.vmem %s3677_s29, 32  ;;  %p3679_p8 = scmp.lt.s32.totalorder %s663_s17, %s3677_s29 }
  0x54   : > { %p3675_p6 = pneg %p3674_p5  ;;  %p3680_p10 = scmp.lt.s32.totalorder %s3678_s6, %s3671_s1 }
  0x56   : > { %p3681_p12 = por %p3680_p10, %p3679_p8 }
  0x58   : > { %p3682_p9 = pnand %p3681_p12, %p3675_p6 }
  0x5a   : > { %3685 = shalt.err (!%p3682_p9)
}
  0x5b   : > { %3327 = dma.hbm_to_vmem [thread:$0]  (!%p4369_p2), %s660_s26, 16, %s663_s17, %s4377_s22  }
  0x5c   : > { %s672_s2 = scalar_lea.vmem [#allocation9], %s4352_s23  ;;  %s2940_s10 = sshll.u32 %s4352_s23, 7 }
  0x5d   : > { %s679_s25 = sshll.u32 %s672_s2, 4  ;;  %s4098_s1 = smov [#allocation9]   ;;  %s680_s25 = int_to_ptr.vmem [resolvable:$true] %s679_s25 }
  0x5e   : > { %s3699_s5 = scalar_lea.vmem %s680_s25, 16  ;;  %s3704_s28 = sshll.u32 %s4098_s1, 4  ;;  %s3705_s28 = int_to_ptr.vmem [resolvable:$false] %s3704_s28 }
  0x5f   : > { %p3700_p4 = scmp.ne.s32.totalorder %s680_s25, %s3699_s5  ;;  %s3706_s29 = scalar_lea.vmem %s3705_s28, 32 }
  0x60   : > { %p3707_p9 = scmp.lt.s32.totalorder %s680_s25, %s3705_s28  ;;  %p3708_p6 = scmp.lt.s32.totalorder %s3706_s29, %s3699_s5 }
  0x61   : > { %p3702_p5 = pnand %p3700_p4, %p4381_p1 }
  0x62   : > { %p3709_p8 = por %p3708_p6, %p3707_p9 }
  0x63   : > { %p3703_p7 = pneg %p3702_p5 }
  0x65   : > { %p3710_p10 = pnand %p3709_p8, %p3703_p7 }
  0x67   : > { %3713 = shalt.err (!%p3710_p10)
}
  0x68   : > { %s4970_s6 = scalar_lea.hbm %s4968_s8, %s4355_s0  ;;  %s3064_s2 = sshll.u32 %s4086_s24, 11 }
  0x69   : > { %3330 = dma.hbm_to_vmem [thread:$0]  (!%p4369_p2), %s4970_s6, 16, %s680_s25, %s4377_s22  }
  0x6a   : > { %s690_s1 = scalar_lea.vmem [#allocation10], %s2940_s10  ;;  %s4971_s9 = sld [smem:[#allocation54_spill]] }
  0x6b   : > { %s697_s28 = sshll.u32 %s690_s1, 4  ;;  %s4099_s26 = smov [#allocation10]   ;;  %s698_s28 = int_to_ptr.vmem [resolvable:$true] %s697_s28 }
  0x6c   : > { %s3727_s30 = scalar_lea.vmem %s698_s28, 2048  ;;  %s3732_s17 = sshll.u32 %s4099_s26, 4  ;;  %s3733_s17 = int_to_ptr.vmem [resolvable:$false] %s3732_s17 }
  0x6d   : > { %p3728_p7 = scmp.ne.s32.totalorder %s698_s28, %s3727_s30  ;;  %s3734_s8 = scalar_lea.vmem %s3733_s17, 4096 }
  0x6e   : > { %p3735_p5 = scmp.lt.s32.totalorder %s698_s28, %s3733_s17  ;;  %p3736_p9 = scmp.lt.s32.totalorder %s3734_s8, %s3727_s30 }
  0x6f   : > { %p3730_p12 = pnand %p3728_p7, %p4381_p1 }
  0x70   : > { %s696_s7 = scalar_lea.hbm %s4971_s9, %s3064_s2  ;;  %p3737_p6 = por %p3736_p9, %p3735_p5 }
  0x71   : > { %p3731_p4 = pneg %p3730_p12 }
  0x73   : > { %p3738_p8 = pnand %p3737_p6, %p3731_p4 }
  0x75   : > { %3741 = shalt.err (!%p3738_p8)
}
  0x76   : > { %s4100_s25 = smov 128   ;;  %s4101_s6 = smov 8  }
  0x77   : > { %3333 = dma.hbm_to_vmem [thread:$0]  (!%p4369_p2), %s696_s7, 2048, %s698_s28, %s4377_s22, %s4100_s25, %s4100_s25, %s4101_s6  }
  0x78   : > { %s4972_s11 = sld [smem:[#allocation56_spill]]  ;;  %s718_s26 = scalar_lea.vmem [#allocation11], %s2940_s10 }
  0x79   : > { %s725_s17 = sshll.u32 %s718_s26, 4  ;;  %s4973_s12 = sld [smem:[#allocation57_spill]]  ;;  %s726_s17 = int_to_ptr.vmem [resolvable:$true] %s725_s17 }
  0x7a   : > { %s3755_s24 = scalar_lea.vmem %s726_s17, 2048  ;;  %s4102_s20 = smov [#allocation11]  }
  0x7b   : > { %p3756_p10 = scmp.ne.s32.totalorder %s726_s17, %s3755_s24  ;;  %s3760_s3 = sshll.u32 %s4102_s20, 4  ;;  %s3761_s3 = int_to_ptr.vmem [resolvable:$false] %s3760_s3 }
  0x7c   : > { %s3762_s7 = scalar_lea.vmem %s3761_s3, 4096  ;;  %p3763_p4 = scmp.lt.s32.totalorder %s726_s17, %s3761_s3 }
  0x7d   : > { %p3758_p7 = pnand %p3756_p10, %p4381_p1  ;;  %p3764_p5 = scmp.lt.s32.totalorder %s3762_s7, %s3755_s24 }
  0x7e   : > { %s724_s29 = scalar_lea.hbm %s4972_s11, %s3064_s2 }
  0x7f   : > { %s743_s9 = scalar_lea.hbm %s4973_s12, %s4355_s0  ;;  %p3759_p12 = pneg %p3758_p7 }
  0x80   : > { %p3765_p9 = por %p3764_p5, %p3763_p4 }
  0x82   : > { %p3766_p6 = pnand %p3765_p9, %p3759_p12 }
  0x84   : > { %3769 = shalt.err (!%p3766_p6)
}
  0x85   : > { %s4103_s10 = smov 64   ;;  %s4104_s2 = smov 4  }
  0x86   : > { %3336 = dma.hbm_to_vmem [thread:$0]  (!%p4369_p2), %s724_s29, 2048, %s726_s17, %s4377_s22, %s4103_s10, %s4103_s10, %s4104_s2  }
  0x87   : > { %s738_s28 = scalar_lea.vmem [#allocation12], %s4352_s23  ;;  %s4105_s25 = smov [#allocation6]  }
  0x88   : > { %s745_s20 = sshll.u32 %s738_s28, 4  ;;  %s566_s3 = sshll.u32 %s4105_s25, 4  ;;  %s746_s20 = int_to_ptr.vmem [resolvable:$true] %s745_s20  ;;  %s567_s3 = int_to_ptr.vmem [resolvable:$true] %s566_s3 }
  0x89   : > { %s3783_s24 = scalar_lea.vmem %s746_s20, 16  ;;  %s4106_s6 = smov [#allocation12]  }
  0x8a   : > { %p3784_p8 = scmp.ne.s32.totalorder %s746_s20, %s3783_s24  ;;  %s3788_s1 = sshll.u32 %s4106_s6, 4  ;;  %s3789_s1 = int_to_ptr.vmem [resolvable:$false] %s3788_s1 }
  0x8b   : > { %s3790_s5 = scalar_lea.vmem %s3789_s1, 32  ;;  %p3791_p12 = scmp.lt.s32.totalorder %s746_s20, %s3789_s1 }
  0x8c   : > { %p3786_p10 = pnand %p3784_p8, %p4381_p1  ;;  %p3792_p4 = scmp.lt.s32.totalorder %s3790_s5, %s3783_s24 }
  0x8e   : > { %p3787_p7 = pneg %p3786_p10  ;;  %p3793_p5 = por %p3792_p4, %p3791_p12 }
  0x90   : > { %p3794_p9 = pnand %p3793_p5, %p3787_p7 }
  0x92   : > { %3797 = shalt.err (!%p3794_p9)
}
  0x93   : > { %3339 = dma.hbm_to_vmem [thread:$0]  (!%p4369_p2), %s743_s9, 16, %s746_s20, %s4377_s22  }
  0x94   : > { %s3809_s17 = scalar_lea.vmem %s567_s3, 16  ;;  %s3816_s8 = scalar_lea.vmem %s567_s3, 32 }
  0x95   : > { %p3810_p6 = scmp.ne.s32.totalorder %s567_s3, %s3809_s17  ;;  %p3817_p12 = scmp.lt.s32.totalorder %s567_s3, %s567_s3 }
  0x96   : > { %p3818_p7 = scmp.lt.s32.totalorder %s3816_s8, %s3809_s17 }
  0x97   : > { %p3812_p8 = pnand %p3810_p6, %p4317_p0 }
  0x98   : > { %p3819_p4 = por %p3818_p7, %p3817_p12 }
  0x99   : > { %p3813_p10 = pneg %p3812_p8 }
  0x9b   : > { %p3820_p5 = pnand %p3819_p4, %p3813_p10 }
  0x9d   : > { %3823 = shalt.err (!%p3820_p5)
}
  0x9e   : > { %s4974_s28 = sld [smem:[#allocation47_spill]]  ;;  %s4107_s9 = smov [#allocation16]  }
  0x9f   : > { %s590_s20 = sshll.u32 %s4107_s9, 4  ;;  %s4975_s13 = sld [smem:[#allocation58_spill]]  ;;  %s591_s20 = int_to_ptr.vmem [resolvable:$true] %s590_s20 }
  0xa0   : > { %s3835_s1 = scalar_lea.vmem %s591_s20, 16  ;;  %s3842_s5 = scalar_lea.vmem %s591_s20, 32 }
  0xa1   : > { %p3836_p9 = scmp.ne.s32.totalorder %s591_s20, %s3835_s1  ;;  %p3843_p10 = scmp.lt.s32.totalorder %s591_s20, %s591_s20 }
  0xa2   : > { %p3844_p12 = scmp.lt.s32.totalorder %s3842_s5, %s3835_s1 }
  0xa3   : > { %p3838_p6 = pnand %p3836_p9, %p4317_p0 }
  0xa4   : > { %3314 = dma.hbm_to_vmem [thread:$0]  (!%p4310_p13), %s4974_s28, 16, %s567_s3, [#allocation7]  }
  0xa5   : > { %s760_s6 = scalar_lea.hbm %s4975_s13, %s4355_s0  ;;  %p3839_p8 = pneg %p3838_p6 }
  0xa6   : > { %p3845_p7 = por %p3844_p12, %p3843_p10 }
  0xa8   : > { %p3846_p4 = pnand %p3845_p7, %p3839_p8 }
  0xaa   : > { %3849 = shalt.err (!%p3846_p4)
}
  0xab   : > { %3320 = dma.hbm_to_vmem [thread:$0]  (!%p4310_p13), %s4889_s16, 16, %s591_s20, [#allocation17]  }
  0xac   : > { %s755_s26 = scalar_lea.vmem [#allocation13], %s4352_s23  ;;  %s4108_s8 = smov [#allocation15]  }
  0xad   : > { %s762_s17 = sshll.u32 %s755_s26, 4  ;;  %s576_s30 = sshll.u32 %s4108_s8, 4  ;;  %s763_s17 = int_to_ptr.vmem [resolvable:$true] %s762_s17  ;;  %s577_s30 = int_to_ptr.vmem [resolvable:$true] %s576_s30 }
  0xae   : > { %s3863_s7 = scalar_lea.vmem %s763_s17, 16  ;;  %s4109_s28 = smov [#allocation13]  }
  0xaf   : > { %p3864_p5 = scmp.ne.s32.totalorder %s763_s17, %s3863_s7  ;;  %s3868_s9 = sshll.u32 %s4109_s28, 4  ;;  %s3869_s9 = int_to_ptr.vmem [resolvable:$false] %s3868_s9 }
  0xb0   : > { %s3870_s25 = scalar_lea.vmem %s3869_s9, 32  ;;  %p3871_p8 = scmp.lt.s32.totalorder %s763_s17, %s3869_s9 }
  0xb1   : > { %p3866_p9 = pnand %p3864_p5, %p4381_p1  ;;  %p3872_p10 = scmp.lt.s32.totalorder %s3870_s25, %s3863_s7 }
  0xb3   : > { %p3867_p6 = pneg %p3866_p9  ;;  %p3873_p12 = por %p3872_p10, %p3871_p8 }
  0xb5   : > { %p3874_p7 = pnand %p3873_p12, %p3867_p6 }
  0xb7   : > { %3877 = shalt.err (!%p3874_p7)
}
  0xb8   : > { %3342 = dma.hbm_to_vmem [thread:$0]  (!%p4369_p2), %s760_s6, 16, %s763_s17, %s4377_s22  }
  0xb9   : > { %s3889_s1 = scalar_lea.vmem %s577_s30, 1024  ;;  %p3897_p3 = scmp.lt.s32.totalorder %s577_s30, %s577_s30 }
  0xba   : > { %p3890_p4 = scmp.ne.s32.totalorder %s577_s30, %s3889_s1  ;;  %p3898_p8 = scmp.lt.s32.totalorder %s3889_s1, %s3889_s1 }
  0xbc   : > { %p3892_p5 = pnand %p3890_p4, %p4317_p0  ;;  %p3899_p6 = por %p3898_p8, %p3897_p3 }
  0xbe   : > { %p3893_p9 = pneg %p3892_p5 }
  0xc0   : > { %p3900_p10 = pnand %p3899_p6, %p3893_p9 }
  0xc2   : > { %3903 = shalt.err (!%p3900_p10)
}
  0xc3   : > { %s4976_s15 = sld [smem:[#allocation60_spill]]  ;;  %s4110_s6 = smov [#allocation18]  }
  0xc4   : > { %s604_s29 = sshll.u32 %s4110_s6, 4  ;;  %s4977_s14 = sld [smem:[#allocation59_spill]]  ;;  %s605_s29 = int_to_ptr.vmem [resolvable:$true] %s604_s29 }
  0xc5   : > { %s3915_s7 = scalar_lea.vmem %s605_s29, 16  ;;  %s3922_s28 = scalar_lea.vmem %s605_s29, 32 }
  0xc6   : > { %p3916_p3 = scmp.ne.s32.totalorder %s605_s29, %s3915_s7  ;;  %p3923_p4 = scmp.lt.s32.totalorder %s605_s29, %s605_s29 }
  0xc7   : > { %p3924_p5 = scmp.lt.s32.totalorder %s3922_s28, %s3915_s7 }
  0xc8   : > { %p3918_p12 = pnand %p3916_p3, %p4317_p0 }
  0xc9   : > { %3317 = dma.hbm_to_vmem [thread:$0]  (!%p4310_p13), %s4976_s15, 1024, %s577_s30, [#allocation7], %s4103_s10, %s4103_s10, %s4104_s2  }
  0xca   : > { %s777_s8 = scalar_lea.hbm %s4977_s14, %s4355_s0  ;;  %p3919_p7 = pneg %p3918_p12 }
  0xcb   : > { %p3925_p9 = por %p3924_p5, %p3923_p4 }
  0xcd   : > { %p3926_p8 = pnand %p3925_p9, %p3919_p7 }
  0xcf   : > { %3929 = shalt.err (!%p3926_p8)
}
  0xd0   : > { %3323 = dma.hbm_to_vmem [thread:$0]  (!%p4310_p13), %s4891_s18, 16, %s605_s29, [#allocation17]  }
  0xd1   : > { %s772_s30 = scalar_lea.vmem [#allocation14], %s4352_s23  ;;  %s4111_s25 = smov [#allocation14]  }
  0xd2   : > { %s779_s9 = sshll.u32 %s772_s30, 4  ;;  %s3948_s20 = sshll.u32 %s4111_s25, 4  ;;  %s780_s9 = int_to_ptr.vmem [resolvable:$true] %s779_s9  ;;  %s3949_s20 = int_to_ptr.vmem [resolvable:$false] %s3948_s20 }
  0xd3   : > { %s3943_s21 = scalar_lea.vmem %s780_s9, 16  ;;  %s3950_s24 = scalar_lea.vmem %s3949_s20, 32 }
  0xd4   : > { %p3944_p0 = scmp.ne.s32.totalorder %s780_s9, %s3943_s21  ;;  %p3951_p3 = scmp.lt.s32.totalorder %s780_s9, %s3949_s20 }
  0xd5   : > { %p3952_p12 = scmp.lt.s32.totalorder %s3950_s24, %s3943_s21 }
  0xd6   : > { %p3946_p6 = pnand %p3944_p0, %p4381_p1 }
  0xd7   : > { %p3953_p7 = por %p3952_p12, %p3951_p3 }
  0xd8   : > { %p3947_p10 = pneg %p3946_p6 }
  0xda   : > { %p3954_p4 = pnand %p3953_p7, %p3947_p10 }
  0xdc   : > { %3957 = shalt.err (!%p3954_p4)
}
  0xdd   : > { %3345 = dma.hbm_to_vmem [thread:$0]  (!%p4369_p2), %s777_s8, 16, %s780_s9, %s4377_s22  }
  0xde   : > { %788 = sbr.rel (%p4302_p11) target bundleno = 3938 (0xf62), region = 96  ;;  %s4979_s1 = sld [smem:[#allocation36_spill]] (!%p4302_p11) }
  0xe4   : > { %p4980_p13 = scmp.eq.s32.totalorder %s4979_s1, 0 }
  0xe6   : > { %4029 = dma.done.wait (%p4980_p13), [#allocation4], 16   ;;  %p4981_p1 = pmov %p4980_p13 }
  0xe8   : > { %4031 = vsyncadd (%p4981_p1), [#allocation4], 4294967280  ;;  %p4982_p5 = pmov %p4981_p1 }
  0xe9   : > { %p4983_p9 = pmov %p4981_p1 }
  0xea   : > { %4033 = dma.done.wait (%p4982_p5), [#allocation7], 16  }
  0xeb   : > { %4035 = vsyncadd (%p4983_p9), [#allocation7], 4294967280  ;;  %s4984_s19 = sld [smem:[#allocation29_spill]]  ;;  %s798_s0 = sand.u32 1, %s4979_s1  }
  0xec   : > { %s4985_s5 = sld [smem:[#allocation37_spill]]  ;;  %s799_s3 = scalar_lea.sflag [#allocation4], %s798_s0 }
  0xf1   : > { %s4514_s22 = sand.u32 1, %s4984_s19  }
  0xf2   : > { %p4986_p11 = scmp.ne.s32.totalorder %s4985_s5, 0 }
  0xf4   : > { %4037 = dma.done.wait (%p4986_p11), %s799_s3, 4176  }
  0xf5   : > { %4039 = vsyncadd (%p4986_p11), %s799_s3, 4294963120  ;;  %s2952_s29 = sshll.u32 %s4514_s22, 7  ;;  %p4987_p2 = pmov %p4981_p1 }
  0xf6   : > { %s4523_s17 = scalar_lea.vmem [#allocation10], %s2952_s29  ;;  %s4525_s8 = scalar_lea.vmem [#allocation11], %s2952_s29 }
  0xf7   : > { %4041 = dma.done.wait (%p4987_p2), [#allocation7], 1024   ;;  %p4988_p8 = pmov %p4981_p1 }
  0xf8   : > { %p4989_p0 = pmov %p4981_p1 }
  0xf9   : > { %4043 = vsyncadd (%p4988_p8), [#allocation7], 4294966272 }
  0xfa   : > { %4045 = dma.done.wait (%p4989_p0), [#allocation17], 32   ;;  %p4990_p6 = pmov %p4989_p0 }
  0xfb   : > { %s4991_s2 = sld [smem:[#allocation27_spill]] }
  0xfc   : > { %4047 = vsyncadd (%p4990_p6), [#allocation17], 4294967264  ;;  %s4992_s30 = sld [smem:[#allocation32_spill]] }
  0xfd   : > { %s4993_s9 = sld [smem:[#allocation31_spill]] }
  0xfe   : > { %s4994_s27 = sld [smem:[#allocation45_spill]] }
  0xff   : > { %s4995_s29 = sld [smem:[#allocation48_spill]] }
 0x100   : > { %s4996_s26 = sld [smem:[#allocation50_spill]] }
 0x101   : > { %s4998_s23 = sld [smem:[#allocation51_spill]]  ;;  %s5000_s3 = sand.u32 1, %s4991_s2  }
 0x102   : > { %p968_p10 = scmp.lt.s32.totalorder %s4992_s30, 1  ;;  %s4999_s0 = sld [smem:[#allocation55_spill]] }
 0x103   : > { %p973_p3 = scmp.lt.s32.totalorder %s4993_s9, 1  ;;  %p2963_p12 = scmp.ne.s32.totalorder %s4993_s9, 0 }
 0x104   : > { %s5036_s30 = smov (!%p968_p10, %s4992_s30), 1 }
 0x105   : > { %s4543_s25 = scalar_select %p973_p3, %s4993_s9, 1 }
 0x106   : > { %s3066_s20 = sshll.u32 %s5036_s30, 4  ;;  %s4997_s30 = sld [smem:[#allocation49_spill]] }
 0x107   : > { %s972_s4 = scalar_lea.vmem %s4994_s27, %s3066_s20  ;;  %s3270_s1 = smul.u32 192, %s4543_s25 }
 0x108   : > { %s3271_s19 = smul.u32 3, %s4543_s25  ;;  %s3067_s5 = sshll.u32 %s4543_s25, 6 }
 0x109   : > { %s4554_s10 = scalar_lea.vmem %s4995_s29, %s3270_s1  ;;  %s4559_s6 = scalar_lea.vmem %s4996_s26, %s3067_s5 }
 0x10a   : > { %s989_s27 = scalar_lea.vmem %s4998_s23, %s4543_s25  ;;  %s2962_s13 = sshll.u32 %s4543_s25, 1 }
 0x10b   : > { %s4574_s1 = scalar_lea.vmem %s4999_s0, %s2962_s13  ;;  %s4578_s29 = scalar_lea.vmem [#allocation19], %s5000_s3 }
 0x10c   : > { %s4564_s12 = scalar_lea.vmem %s4997_s30, %s3271_s19  ;;  %998 = sbr.rel (%p2963_p12) target bundleno = 585 (0x249), region = 148 }
 0x111   : > { %v999_v0 = vld [vmem:[%s972_s4] sm:$0xff]  ;;  %v1000_v1 = vld [vmem:[%s972_s4 + $0x8] sm:$0xff]  ;;  %v2964_v17 = vld [vmem:[#allocation3] ss:$0 sm:$0xff] }
 0x112   : > { %1003 = vadd.xlane.f32.xlu0 %v999_v0  ;;  %v2965_v19 = vld [vmem:[#allocation6] ss:$0 sm:$0xff] }
 0x116   : > { %1005 = vadd.xlane.f32.xlu0 %v1000_v1 }
 0x19b   : > { %v1004_v2 = vpop.xlane.xlu0 %1003 }
 0x19c   : > { %v1008_v3 = vmul.f32 0.0078125, %v1004_v2 }
 0x19e   : > { %v1010_v4 = vsub.f32 %v999_v0, %v1008_v3 }
 0x19f   : > { %v1006_v5 = vpop.xlane.xlu0 %1005 }
 0x1a0   : > { %v1009_v6 = vmul.f32 0.0078125, %v1006_v5  ;;  %v1012_v7 = vmul.f32 %v1010_v4, %v1010_v4 }
 0x1a2   : > { %v1011_v8 = vsub.f32 %v1000_v1, %v1009_v6  ;;  %1014 = vadd.xlane.f32.xlu1 %v1012_v7 }
 0x1a4   : > { %v1013_v9 = vmul.f32 %v1011_v8, %v1011_v8 }
 0x1a6   : > { %1016 = vadd.xlane.f32.xlu1 %v1013_v9 }
 0x22b   : > { %v1015_v10 = vpop.xlane.xlu1 %1014 }
 0x22c   : > { %v1018_v11 = vmul.f32 0.0078125, %v1015_v10 }
 0x22e   : > { %v1020_v12 = vadd.f32 1e-12, %v1018_v11 }
 0x22f   : > { %v1017_v13 = vpop.xlane.xlu1 %1016 }
 0x230   : > { %3467 = vrsqrt.f32 %v1020_v12  ;;  %v1019_v14 = vmul.f32 0.0078125, %v1017_v13 }
 0x232   : > { %v1021_v15 = vadd.f32 1e-12, %v1019_v14 }
 0x234   : > { %3469 = vrsqrt.f32 %v1021_v15 }
 0x23d   : > { %v3468_v16 = vpop.eup %3467 }
 0x23e   : > { %v1024_v18 = vmul.f32 %v3468_v16, %v1010_v4 }
 0x240   : > { %v1032_v20 = vmul.f32 %v2964_v17, %v1024_v18 }
 0x241   : > { %v3470_v21 = vpop.eup %3469 }
 0x242   : > { %v1040_v22 = vadd.f32 %v2965_v19, %v1032_v20  ;;  %v1025_v23 = vmul.f32 %v3470_v21, %v1011_v8 }
 0x244   : > { %1042 = vst [vmem:[#allocation2] sm:$0xff] %v1040_v22  ;;  %v1033_v24 = vmul.f32 %v2964_v17, %v1025_v23 }
 0x246   : > { %v1041_v25 = vadd.f32 %v2965_v19, %v1033_v24 }
 0x248   : > { %1043 = vst [vmem:[#allocation2 + $0x8] sm:$0xff] %v1041_v25 }
 0x249 PF: > { %v3486_v26 = vld [vmem:[%s4554_s10 + $0xac] ss:$12 sps:$4 sm:$0xff]   ;;  %v3488_v27 = vld [vmem:[%s4554_s10 + $0xa8] ss:$12 sps:$4 sm:$0xff]   ;;  %v4112_v28 = vmov 0   ;;  %v4113_v29 = vmov 0.0   ;;  %v1081_v55 = vlaneseq }
 0x24a   : > { %1256 = vmatprep.mubr.bf16.mxu0 %v4112_v28  ;;  %3142 = vmatprep.subr.bf16.mxu1 %v4113_v29  ;;  %v3489_v30 = vld [vmem:[%s4554_s10 + $0x94] ss:$12 sps:$4 sm:$0xff]   ;;  %v3491_v31 = vld [vmem:[%s4554_s10 + $0x90] ss:$12 sps:$4 sm:$0xff]   ;;  %v3494_v33 = vld [vmem:[%s4554_s10 + $0x78] ss:$12 sps:$4 sm:$0xff]  }
 0x24b   : > { %1224 = vmatprep.subr.bf16.mxu0 %v3486_v26  ;;  %v3492_v32 = vld [vmem:[%s4554_s10 + $0x7c] ss:$12 sps:$4 sm:$0xff]   ;;  %v3495_v34 = vld [vmem:[%s4554_s10 + $0x64] ss:$12 sps:$4 sm:$0xff]   ;;  %v3497_v35 = vld [vmem:[%s4554_s10 + $0x60] ss:$12 sps:$4 sm:$0xff]  }
 0x24c   : > { %1225 = vmatpush1.bf16.msra.mxu0 %v3488_v27  ;;  %v3498_v36 = vld [vmem:[%s4554_s10 + $0x4c] ss:$12 sps:$4 sm:$0xff]   ;;  %v3510_v37 = vld [vmem:[%s4554_s10 + $0xb0] ss:$12 sps:$4 sm:$0xff]   ;;  %v3500_v39 = vld [vmem:[%s4554_s10 + $0x48] ss:$12 sps:$4 sm:$0xff]  }
 0x24d   : > { %1226 = vmatprep.subr.bf16.mxu0 %v3489_v30  ;;  %3143 = vmatpush3.bf16.msra.mxu1 %v3510_v37  ;;  %v3511_v38 = vld [vmem:[%s4554_s10 + $0x98] ss:$12 sps:$4 sm:$0xff]   ;;  %v3501_v40 = vld [vmem:[%s4554_s10 + $0x34] ss:$12 sps:$4 sm:$0xff]   ;;  %v3503_v41 = vld [vmem:[%s4554_s10 + $0x30] ss:$12 sps:$4 sm:$0xff]  }
 0x24e   : > { %3144 = vmatprep.subr.bf16.mxu1 %v4113_v29  ;;  %v3504_v42 = vld [vmem:[%s4554_s10 + $0x1c] ss:$12 sps:$4 sm:$0xff]   ;;  %v3512_v43 = vld [vmem:[%s4554_s10 + $0x80] ss:$12 sps:$4 sm:$0xff]   ;;  %v3506_v45 = vld [vmem:[%s4554_s10 + $0x18] ss:$12 sps:$4 sm:$0xff]  }
 0x24f   : > { %v3513_v44 = vld [vmem:[%s4554_s10 + $0x68] ss:$12 sps:$4 sm:$0xff]   ;;  %v3507_v46 = vld [vmem:[%s4554_s10 + $0x4] ss:$12 sps:$4 sm:$0xff]   ;;  %v3509_v48 = vld [vmem:[%s4554_s10] ss:$12 sps:$4 sm:$0xff]  }
 0x250   : > { %1227 = vmatpush1.bf16.msra.mxu0 %v3491_v31  ;;  %v3514_v47 = vld [vmem:[%s4554_s10 + $0x50] ss:$12 sps:$4 sm:$0xff]   ;;  %v4607_v49 = vld [vmem:[#allocation2] sm:$0xff]  ;;  %v4609_v50 = vld [vmem:[#allocation2 + $0x8] sm:$0xff]  ;;  %vm4114_vm0 = vmmov 0   ;;  %v4628_v56 = vshrl.u32 %v1081_v55, 7 }
 0x251   : > { %1228 = vmatprep.subr.bf16.mxu0 %v3492_v32  ;;  %3145 = vmatpush3.bf16.msra.mxu1 %v3511_v38  ;;  %v3515_v51 = vld [vmem:[%s4554_s10 + $0x38] ss:$12 sps:$4 sm:$0xff]   ;;  %v1046_v52 = vpack.c.bf16 %v4609_v50, %v4607_v49  ;;  %v3516_v53 = vld [vmem:[%s4554_s10 + $0x20] ss:$12 sps:$4 sm:$0xff]   ;;  %v3517_v54 = vld [vmem:[%s4554_s10 + $0x8] ss:$12 sps:$4 sm:$0xff]  }
 0x252   : > { %3146 = vmatprep.subr.bf16.mxu1 %v4113_v29  ;;  %3158 = vmatprep.mubr.msk.bf16.mxu1 %vm4114_vm0, %v4113_v29  ;;  %v1087_v57 = vsub.s32 1, %v4628_v56  ;;  %v1079_v59 = vld [vmem:[%s4564_s12] sm:$0x7]  ;;  %v1083_v0 = vsub.s32 0, %v4628_v56  ;;  %vm1311_vm1 = vcmask 261120   ;;  %v1091_v9 = vsub.s32 2, %v4628_v56 }
 0x253   : > { %vm1361_vm2 = vcmask 130048   ;;  %s4115_s11 = smov 96   ;;  %s4116_s12 = smov 32   ;;  %vm1827_vm3 = vcmask 523264   ;;  %vm1830_vm4 = vcmask 785408  }
 0x254   : > { %1229 = vmatpush1.bf16.msra.mxu0 %v3494_v33  ;;  %v1088_v61 = vrot.slane %v1079_v59, %v1087_v57  ;;  %v1084_v4 = vrot.slane %v1079_v59, %v1083_v0  ;;  %v1092_v10 = vrot.slane %v1079_v59, %v1091_v9  ;;  %s4117_s13 = smov 64   ;;  %s5002_s26 = scalar_lea.vmem [#allocation8], %s4514_s22 }
 0x255   : > { %1230 = vmatprep.subr.bf16.mxu0 %v3495_v34  ;;  %3147 = vmatpush3.bf16.msra.mxu1 %v3512_v43  ;;  %s5005_s7 = scalar_lea.vmem [#allocation13], %s4514_s22  ;;  %s5006_s28 = scalar_lea.vmem [#allocation14], %s4514_s22 }
 0x256   : > { %3148 = vmatprep.subr.bf16.mxu1 %v4113_v29  ;;  %s5007_s10 = sld [smem:[#allocation31_spill]] }
 0x258   : > { %1231 = vmatpush1.bf16.msra.mxu0 %v3497_v35 }
 0x259   : > { %1232 = vmatprep.subr.bf16.mxu0 %v3498_v36  ;;  %3149 = vmatpush3.bf16.msra.mxu1 %v3513_v44 }
 0x25a   : > { %3150 = vmatprep.subr.bf16.mxu1 %v4113_v29 }
 0x25c   : > { %1233 = vmatpush1.bf16.msra.mxu0 %v3500_v39  ;;  %p3044_p7 = scmp.ne.s32.totalorder %s5007_s10, 1 }
 0x25d   : > { %1234 = vmatprep.subr.bf16.mxu0 %v3501_v40  ;;  %3151 = vmatpush3.bf16.msra.mxu1 %v3514_v47  ;;  %s5008_s9 = sld [smem:[#allocation61_spill]] (!%p3044_p7) }
 0x25e   : > { %3152 = vmatprep.subr.bf16.mxu1 %v4113_v29 }
 0x260   : > { %1235 = vmatpush1.bf16.msra.mxu0 %v3503_v41 }
 0x261   : > { %1236 = vmatprep.subr.bf16.mxu0 %v3504_v42  ;;  %3153 = vmatpush3.bf16.msra.mxu1 %v3515_v51 }
 0x262   : > { %3154 = vmatprep.subr.bf16.mxu1 %v4113_v29 }
 0x264   : > { %1237 = vmatpush1.bf16.msra.mxu0 %v3506_v45 }
 0x265   : > { %1238 = vmatprep.subr.bf16.mxu0 %v3507_v46  ;;  %3155 = vmatpush3.bf16.msra.mxu1 %v3516_v53 }
 0x266   : > { %3156 = vmatprep.subr.bf16.mxu1 %v4113_v29 }
 0x268   : > { %1239 = vmatpush1.bf16.msra.mxu0 %v3509_v48 }
 0x269   : > { %3186 = vmatprep.subr.bf16.mxu0 %v4113_v29  ;;  %3157 = vmatpush3.bf16.msra.mxu1 %v3517_v54 }
 0x26a   : > { %3162 = vmatprep.subr.bf16.mxu1 %v4113_v29 }
 0x26b   : > { %1257 = vmatmul.mubr.bf16.vlgmr.msra.gmra.mxu0 %v1046_v52 }
 0x26c   : > { %3188 = vmatprep.mubr.msk.bf16.mxu0 %vm4114_vm0, %v4113_v29  ;;  %3159 = vmatmul.mubr.bf16.vlgmr.msra.gmra.mxu1 %v1046_v52 }
 0x26d   : > { %3164 = vmatprep.mubr.msk.bf16.mxu1 %vm4114_vm0, %v4113_v29 }
 0x32b   : > { %v1258_v58 = vpop.f32.mrf.mxu0 }
 0x32c   : > { %v1259_v7 = vadd.f32 %v1258_v58, %v1084_v4  ;;  %v1301_v11 = vpop.f32.mrf.mxu1 }
 0x32d   : > { %v1260_v60 = vpop.f32.mrf.mxu0  ;;  %v1302_v13 = vadd.f32 %v1301_v11, %v1092_v10 }
 0x32e   : > { %v1261_v1 = vadd.f32 %v1260_v60, %v1088_v61  ;;  %v3160_v12 = vpop.f32.mrf.mxu1 }
 0x32f   : > { %v1262_v62 = vpop.f32.mrf.mxu0 }
 0x330   : > { %v1263_v6 = vadd.f32 %v1262_v62, %v1084_v4  ;;  %v1304_v14 = vpop.f32.mrf.mxu1 }
 0x331   : > { %v1264_v63 = vpop.f32.mrf.mxu0  ;;  %v1305_v15 = vadd.f32 %v1304_v14, %v1092_v10 }
 0x332   : > { %v1265_v2 = vadd.f32 %v1264_v63, %v1088_v61  ;;  %v1308_v8 = vpack.c.bf16 %v1263_v6, %v1259_v7  ;;  %v3161_v16 = vpop.f32.mrf.mxu1 }
 0x333   : > { %v4643_v17 = vpack.c.bf16 %v1305_v15, %v1302_v13 }
 0x334   : > { %v1309_v3 = vpack.c.bf16 %v1265_v2, %v1261_v1 }
 0x336   : > { %v1316_v5 = vsel %vm1311_vm1, %v1309_v3, 0 }
 0x337   : > { %3163 = vmatpush3.bf16.xpose.msra.mxu1 %v1316_v5 }
 0x338   : > { %3168 = vmatprep.subr.bf16.mxu1 %v4113_v29 }
 0x33e   : > { %3165 = vmatmul.mubr.msk.bf16.vlgmr.msra.gmra.mxu1 %vm1311_vm1, %v1308_v8 }
 0x33f   : > { %3170 = vmatprep.mubr.msk.bf16.mxu1 %vm4114_vm0, %v4113_v29  ;;  %3169 = vmatpush3.bf16.msra.mxu1 %v4643_v17 }
 0x340   : > { %3174 = vmatprep.subr.bf16.mxu1 %v4113_v29 }
 0x3fe   : > { %v1352_v18 = vpop.f32.mrf.mxu1 }
 0x3ff   : > { %v1359_v19 = vmul.f32 0.17677669, %v1352_v18 }
 0x400   : > { %v3166_v20 = vpop.f32.mrf.mxu1 }
 0x401   : > { %v1362_v21 = vsel %vm1361_vm2, %v1359_v19, -inf }
 0x402   : > { %1363 = vmax.xlane.f32.xlu0 %v1362_v21  ;;  %v1355_v22 = vpop.f32.mrf.mxu1 }
 0x403   : > { %v1360_v23 = vmul.f32 0.17677669, %v1355_v22 }
 0x404   : > { %v3167_v24 = vpop.f32.mrf.mxu1 }
 0x405   : > { %v1365_v25 = vsel %vm1361_vm2, %v1360_v23, -inf }
 0x406   : > { %1366 = vmax.xlane.f32.xlu0 %v1365_v25 }
 0x41c   : > { %1433 = vrot.lane.b32.xlu0 %v1309_v3, %s4115_s11 }
 0x420   : > { %1680 = vrot.lane.b32.xlu0 %v1309_v3, %s4116_s12 }
 0x48b   : > { %v1364_v26 = vpop.xlane.xlu0 %1363 }
 0x48c   : > { %v1368_v27 = vsub.f32 %v1359_v19, %v1364_v26 }
 0x48e   : > { %v1370_v30 = vmul.f32 1.442695, %v1368_v27 }
 0x48f   : > { %v1367_v31 = vpop.xlane.xlu0 %1366 }
 0x490   : > { %3566 = vpow2.f32 %v1370_v30  ;;  %v1369_v32 = vsub.f32 %v1360_v23, %v1367_v31 }
 0x492   : > { %v1372_v33 = vmul.f32 1.442695, %v1369_v32 }
 0x493   : > { %v1434_v41 = vpop.permute.xlu0 %1433 }
 0x494   : > { %3568 = vpow2.f32 %v1372_v33  ;;  %v1439_v54 = vsel %vm1311_vm1, %v1434_v41, 0 }
 0x497   : > { %v1681_v46 = vpop.permute.xlu0 %1680 }
 0x498   : > { %v1686_v52 = vsel %vm1311_vm1, %v1681_v46, 0 }
 0x49d   : > { %v3567_v34 = vpop.eup %3566 }
 0x49e   : > { %v1374_v35 = vsel %vm1361_vm2, %v3567_v34, 0.0 }
 0x49f   : > { %1375 = vadd.xlane.f32.xlu1 %v1374_v35 }
 0x4a1   : > { %v3569_v36 = vpop.eup %3568 }
 0x4a2   : > { %v1377_v37 = vsel %vm1361_vm2, %v3569_v36, 0.0 }
 0x4a3   : > { %1378 = vadd.xlane.f32.xlu1 %v1377_v37 }
 0x4b4   : > { %1430 = vrot.lane.b32.xlu1 %v1308_v8, %s4115_s11 }
 0x4b8   : > { %1557 = vrot.lane.b32.xlu1 %v1309_v3, %s4117_s13 }
 0x4bc   : > { %1555 = vrot.lane.b32.xlu1 %v1308_v8, %s4117_s13 }
 0x4c0   : > { %1678 = vrot.lane.b32.xlu1 %v1308_v8, %s4116_s12 }
 0x528   : > { %v1376_v38 = vpop.xlane.xlu1 %1375 }
 0x529   : > { %3570 = vrcp.f32 %v1376_v38 }
 0x52c   : > { %v1379_v39 = vpop.xlane.xlu1 %1378 }
 0x52d   : > { %3572 = vrcp.f32 %v1379_v39 }
 0x530   : > { %v1431_v40 = vpop.permute.xlu1 %1430 }
 0x534   : > { %v1558_v42 = vpop.permute.xlu1 %1557 }
 0x535   : > { %v1563_v43 = vsel %vm1311_vm1, %v1558_v42, 0 }
 0x536   : > { %3187 = vmatpush3.bf16.xpose.msra.mxu0 %v1563_v43  ;;  %v3571_v44 = vpop.eup %3570 }
 0x537   : > { %3198 = vmatprep.subr.bf16.mxu0 %v4113_v29  ;;  %v1382_v47 = vmul.f32 %v3571_v44, %v3567_v34 }
 0x538   : > { %v1556_v51 = vpop.permute.xlu1 %1555 }
 0x53a   : > { %v3573_v45 = vpop.eup %3572 }
 0x53b   : > { %v1383_v48 = vmul.f32 %v3573_v45, %v3569_v36 }
 0x53c   : > { %v1679_v55 = vpop.permute.xlu1 %1678 }
 0x53d   : > { %3189 = vmatmul.mubr.msk.bf16.vlgmr.msra.gmra.mxu0 %vm1311_vm1, %v1556_v51  ;;  %v1384_v53 = vpack.c.bf16 %v1383_v48, %v1382_v47 }
 0x53e   : > { %3199 = vmatpush3.bf16.xpose.msra.mxu0 %v1686_v52  ;;  %3200 = vmatprep.mubr.msk.bf16.mxu0 %vm4114_vm0, %v4113_v29 }
 0x53f   : > { %3171 = vmatmul.mubr.msk.bf16.vlgmr.msra.gmra.mxu1 %vm1361_vm2, %v1384_v53  ;;  %3210 = vmatprep.subr.bf16.mxu0 %v4113_v29 }
 0x540   : > { %3175 = vmatpush3.bf16.xpose.msra.mxu1 %v1439_v54  ;;  %3176 = vmatprep.mubr.msk.bf16.mxu1 %vm4114_vm0, %v4113_v29 }
 0x541   : > { %3180 = vmatprep.subr.bf16.mxu1 %v4113_v29 }
 0x545   : > { %3201 = vmatmul.mubr.msk.bf16.vlgmr.msra.gmra.mxu0 %vm1311_vm1, %v1679_v55 }
 0x546   : > { %3226 = vmatprep.mubr.msk.bf16.mxu0 %vm4114_vm0, %v4113_v29 }
 0x547   : > { %3177 = vmatmul.mubr.msk.bf16.vlgmr.msra.gmra.mxu1 %vm1311_vm1, %v1431_v40 }
 0x548   : > { %3182 = vmatprep.mubr.msk.bf16.mxu1 %vm4114_vm0, %v4113_v29 }
 0x5fd   : > { %v1599_v58 = vpop.f32.mrf.mxu0 }
 0x5fe   : > { %v1606_v9 = vmul.f32 0.17677669, %v1599_v58 }
 0x5ff   : > { %v4675_v59 = vpop.f32.mrf.mxu1  ;;  %v3190_v60 = vpop.f32.mrf.mxu0 }
 0x600   : > { %v1608_v18 = vsel %vm1361_vm2, %v1606_v9, -inf }
 0x601   : > { %v3172_v61 = vpop.f32.mrf.mxu1  ;;  %v1602_v62 = vpop.f32.mrf.mxu0 }
 0x602   : > { %v1607_v15 = vmul.f32 0.17677669, %v1602_v62 }
 0x603   : > { %v4677_v63 = vpop.f32.mrf.mxu1  ;;  %v3191_v1 = vpop.f32.mrf.mxu0 }
 0x604   : > { %v1611_v21 = vsel %vm1361_vm2, %v1607_v15, -inf }
 0x605   : > { %v3173_v2 = vpop.f32.mrf.mxu1  ;;  %v1722_v3 = vpop.f32.mrf.mxu0 }
 0x606   : > { %v1729_v20 = vmul.f32 0.17677669, %v1722_v3 }
 0x607   : > { %v1475_v4 = vpop.f32.mrf.mxu1  ;;  %v3202_v5 = vpop.f32.mrf.mxu0 }
 0x608   : > { %v1482_v6 = vmul.f32 0.17677669, %v1475_v4  ;;  %v1731_v23 = vsel %vm1361_vm2, %v1729_v20, -inf }
 0x609   : > { %v3178_v7 = vpop.f32.mrf.mxu1  ;;  %v1725_v8 = vpop.f32.mrf.mxu0 }
 0x60a   : > { %v1484_v10 = vsel %vm1361_vm2, %v1482_v6, -inf  ;;  %v1730_v16 = vmul.f32 0.17677669, %v1725_v8 }
 0x60b   : > { %v3203_v11 = vpop.f32.mrf.mxu0  ;;  %1485 = vmax.xlane.f32.xlu0 %v1484_v10  ;;  %v1478_v12 = vpop.f32.mrf.mxu1 }
 0x60c   : > { %v1483_v13 = vmul.f32 0.17677669, %v1478_v12  ;;  %v1734_v22 = vsel %vm1361_vm2, %v1730_v16, -inf }
 0x60d   : > { %v3179_v14 = vpop.f32.mrf.mxu1 }
 0x60e   : > { %v1487_v19 = vsel %vm1361_vm2, %v1483_v13, -inf }
 0x60f   : > { %1609 = vmax.xlane.f32.xlu0 %v1608_v18  ;;  %1488 = vmax.xlane.f32.xlu1 %v1487_v19 }
 0x613   : > { %1612 = vmax.xlane.f32.xlu0 %v1611_v21  ;;  %1735 = vmax.xlane.f32.xlu1 %v1734_v22 }
 0x617   : > { %1732 = vmax.xlane.f32.xlu0 %v1731_v23  ;;  %v3518_v23 = vld [vmem:[%s4559_s6 + $0x38] sm:$0xff]  }
 0x618   : > { %3211 = vmatpush3.bf16.msra.mxu0 %v3518_v23  ;;  %v3532_v23 = vld [vmem:[%s4523_s17 + $0x50] ss:$8 sps:$4 sm:$0xff]  }
 0x619   : > { %3212 = vmatprep.subr.bf16.mxu0 %v4113_v29 }
 0x694   : > { %v1486_v24 = vpop.xlane.xlu0 %1485 }
 0x695   : > { %v1490_v35 = vsub.f32 %v1482_v6, %v1486_v24  ;;  %v3519_v24 = vld [vmem:[%s4559_s6 + $0x30] sm:$0xff]  }
 0x696   : > { %3213 = vmatpush3.bf16.msra.mxu0 %v3519_v24  ;;  %v3535_v24 = vld [vmem:[%s4523_s17 + $0x40] ss:$8 sps:$4 sm:$0xff]  }
 0x697   : > { %v1492_v41 = vmul.f32 1.442695, %v1490_v35  ;;  %3214 = vmatprep.subr.bf16.mxu0 %v4113_v29 }
 0x698   : > { %v1610_v25 = vpop.xlane.xlu0 %1609  ;;  %v1489_v26 = vpop.xlane.xlu1 %1488 }
 0x699   : > { %v1614_v27 = vsub.f32 %v1606_v9, %v1610_v25  ;;  %v1491_v36 = vsub.f32 %v1483_v13, %v1489_v26  ;;  %v3520_v25 = vld [vmem:[%s4559_s6 + $0x28] sm:$0xff]   ;;  %v3521_v26 = vld [vmem:[%s4559_s6 + $0x20] sm:$0xff]  }
 0x69a   : > { %3215 = vmatpush3.bf16.msra.mxu0 %v3520_v25  ;;  %v3537_v25 = vld [vmem:[%s4523_s17 + $0x44] ss:$8 sps:$4 sm:$0xff]  }
 0x69b   : > { %v1616_v30 = vmul.f32 1.442695, %v1614_v27  ;;  %v1494_v42 = vmul.f32 1.442695, %v1491_v36  ;;  %3216 = vmatprep.subr.bf16.mxu0 %v4113_v29  ;;  %v3522_v27 = vld [vmem:[%s4559_s6 + $0x18] sm:$0xff]  }
 0x69c   : > { %v1613_v31 = vpop.xlane.xlu0 %1612  ;;  %v1736_v32 = vpop.xlane.xlu1 %1735 }
 0x69d   : > { %3574 = vpow2.f32 %v1616_v30  ;;  %v1615_v33 = vsub.f32 %v1607_v15, %v1613_v31  ;;  %v1738_v34 = vsub.f32 %v1730_v16, %v1736_v32  ;;  %v3523_v31 = vld [vmem:[%s4559_s6 + $0x10] sm:$0xff]  }
 0x69e   : > { %3217 = vmatpush3.bf16.msra.mxu0 %v3521_v26  ;;  %v3540_v26 = vld [vmem:[%s4523_s17 + $0x34] ss:$8 sps:$4 sm:$0xff]  }
 0x69f   : > { %v1618_v37 = vmul.f32 1.442695, %v1615_v33  ;;  %v1741_v38 = vmul.f32 1.442695, %v1738_v34  ;;  %3218 = vmatprep.subr.bf16.mxu0 %v4113_v29  ;;  %v3524_v34 = vld [vmem:[%s4559_s6 + $0x8] sm:$0xff]  }
 0x6a0   : > { %v1733_v39 = vpop.xlane.xlu0 %1732 }
 0x6a1   : > { %3576 = vpow2.f32 %v1618_v37  ;;  %v1737_v40 = vsub.f32 %v1729_v20, %v1733_v39 }
 0x6a2   : > { %3578 = vpow2.f32 %v1741_v38  ;;  %3219 = vmatpush3.bf16.msra.mxu0 %v3522_v27  ;;  %v3525_v38 = vld [vmem:[%s4559_s6] sm:$0xff]   ;;  %v3538_v27 = vld [vmem:[%s4523_s17 + $0x30] ss:$8 sps:$4 sm:$0xff]  }
 0x6a3   : > { %v1739_v43 = vmul.f32 1.442695, %v1737_v40  ;;  %3220 = vmatprep.subr.bf16.mxu0 %v4113_v29 }
 0x6a5   : > { %3580 = vpow2.f32 %v1739_v43 }
 0x6a6   : > { %3582 = vpow2.f32 %v1492_v41  ;;  %3221 = vmatpush3.bf16.msra.mxu0 %v3523_v31  ;;  %v3546_v31 = vld [vmem:[%s4523_s17 + $0x14] ss:$8 sps:$4 sm:$0xff]  }
 0x6a7   : > { %3584 = vpow2.f32 %v1494_v42  ;;  %3222 = vmatprep.subr.bf16.mxu0 %v4113_v29 }
 0x6aa   : > { %v3575_v44 = vpop.eup %3574  ;;  %3223 = vmatpush3.bf16.msra.mxu0 %v3524_v34  ;;  %v3547_v34 = vld [vmem:[%s4523_s17] ss:$8 sps:$4 sm:$0xff]  }
 0x6ab   : > { %v1620_v45 = vsel %vm1361_vm2, %v3575_v44, 0.0  ;;  %3224 = vmatprep.subr.bf16.mxu0 %v4113_v29 }
 0x6ac   : > { %1621 = vadd.xlane.f32.xlu0 %v1620_v45 }
 0x6ae   : > { %v3577_v46 = vpop.eup %3576  ;;  %3225 = vmatpush3.bf16.msra.mxu0 %v3525_v38 }
 0x6af   : > { %v1623_v47 = vsel %vm1361_vm2, %v3577_v46, 0.0  ;;  %v3579_v48 = vpop.eup %3578 }
 0x6b0   : > { %1624 = vadd.xlane.f32.xlu1 %v1623_v47  ;;  %v1746_v54 = vsel %vm1361_vm2, %v3579_v48, 0.0 }
 0x6b2   : > { %v3581_v51 = vpop.eup %3580 }
 0x6b3   : > { %v3583_v52 = vpop.eup %3582  ;;  %v1743_v53 = vsel %vm1361_vm2, %v3581_v51, 0.0 }
 0x6b4   : > { %v3585_v55 = vpop.eup %3584  ;;  %1744 = vadd.xlane.f32.xlu0 %v1743_v53  ;;  %1747 = vadd.xlane.f32.xlu1 %v1746_v54  ;;  %v1496_v58 = vsel %vm1361_vm2, %v3583_v52, 0.0 }
 0x6b5   : > { %v1499_v60 = vsel %vm1361_vm2, %v3585_v55, 0.0 }
 0x6b8   : > { %1497 = vadd.xlane.f32.xlu0 %v1496_v58  ;;  %1500 = vadd.xlane.f32.xlu1 %v1499_v60 }
 0x6c9   : > { %1631 = vrot.lane.b32.xlu1 %v4643_v17, %s4117_s13 }
 0x6cd   : > { %1754 = vrot.lane.b32.xlu1 %v4643_v17, %s4116_s12 }
 0x6ce   : > { %1508 = vrot.lane.b32.xlu0 %v4643_v17, %s4115_s11 }
 0x735   : > { %v1622_v61 = vpop.xlane.xlu0 %1621 }
 0x739   : > { %v1625_v62 = vpop.xlane.xlu1 %1624 }
 0x73d   : > { %v1745_v1 = vpop.xlane.xlu0 %1744  ;;  %v1748_v2 = vpop.xlane.xlu1 %1747 }
 0x741   : > { %v1498_v3 = vpop.xlane.xlu0 %1497  ;;  %v1501_v4 = vpop.xlane.xlu1 %1500 }
 0x742   : > { %3586 = vrcp.f32 %v1498_v3 }
 0x743   : > { %3588 = vrcp.f32 %v1501_v4 }
 0x744   : > { %3590 = vrcp.f32 %v1625_v62 }
 0x745   : > { %v1509_v5 = vpop.permute.xlu0 %1508  ;;  %3592 = vrcp.f32 %v1622_v61  ;;  %v1632_v11 = vpop.permute.xlu1 %1631 }
 0x746   : > { %3181 = vmatpush3.bf16.msra.mxu1 %v1509_v5  ;;  %3594 = vrcp.f32 %v1745_v1  ;;  %v2998_v5 = vld [vmem:[%s989_s27] ss:$0 sm:$0xff] }
 0x747   : > { %3192 = vmatprep.subr.bf16.mxu1 %v4113_v29  ;;  %3596 = vrcp.f32 %v1748_v2 }
 0x749   : > { %v1755_v19 = vpop.permute.xlu1 %1754 }
 0x74f   : > { %v3587_v6 = vpop.eup %3586 }
 0x750   : > { %v3589_v7 = vpop.eup %3588  ;;  %v1504_v8 = vmul.f32 %v3587_v6, %v3583_v52 }
 0x751   : > { %v1505_v17 = vmul.f32 %v3589_v7, %v3585_v55  ;;  %v3591_v10 = vpop.eup %3590 }
 0x752   : > { %v3593_v12 = vpop.eup %3592  ;;  %v1629_v13 = vmul.f32 %v3591_v10, %v3577_v46 }
 0x753   : > { %v1506_v9 = vpack.c.bf16 %v1505_v17, %v1504_v8  ;;  %v1628_v14 = vmul.f32 %v3593_v12, %v3575_v44  ;;  %v3595_v15 = vpop.eup %3594  ;;  %v3528_v12 = vld [vmem:[%s4523_s17 + $0x74] ss:$8 sps:$4 sm:$0xff]  }
 0x754   : > { %v3597_v18 = vpop.eup %3596  ;;  %v1751_v20 = vmul.f32 %v3595_v15, %v3581_v51 }
 0x755   : > { %3183 = vmatmul.mubr.msk.bf16.vlgmr.msra.gmra.mxu1 %vm1361_vm2, %v1506_v9  ;;  %v1630_v16 = vpack.c.bf16 %v1629_v13, %v1628_v14  ;;  %v1752_v21 = vmul.f32 %v3597_v18, %v3579_v48 }
 0x756   : > { %3193 = vmatpush3.bf16.msra.mxu1 %v1632_v11  ;;  %3194 = vmatprep.mubr.msk.bf16.mxu1 %vm4114_vm0, %v4113_v29  ;;  %v3526_v11 = vld [vmem:[%s4523_s17 + $0x70] ss:$8 sps:$4 sm:$0xff]  }
 0x757   : > { %3204 = vmatprep.subr.bf16.mxu1 %v4113_v29  ;;  %v1753_v22 = vpack.c.bf16 %v1752_v21, %v1751_v20  ;;  %v3531_v20 = vld [vmem:[%s4523_s17 + $0x64] ss:$8 sps:$4 sm:$0xff]   ;;  %v3529_v21 = vld [vmem:[%s4523_s17 + $0x60] ss:$8 sps:$4 sm:$0xff]  }
 0x75d   : > { %3195 = vmatmul.mubr.msk.bf16.vlgmr.msra.gmra.mxu1 %vm1361_vm2, %v1630_v16 }
 0x75e   : > { %3205 = vmatpush3.bf16.msra.mxu1 %v1755_v19  ;;  %3206 = vmatprep.mubr.msk.bf16.mxu1 %vm4114_vm0, %v4113_v29 }
 0x75f   : > { %2098 = vmatprep.subr.bf16.mxu1 %v3528_v12 }
 0x765   : > { %3207 = vmatmul.mubr.msk.bf16.vlgmr.msra.gmra.mxu1 %vm1361_vm2, %v1753_v22  ;;  %v3534_v22 = vld [vmem:[%s4523_s17 + $0x54] ss:$8 sps:$4 sm:$0xff]  }
 0x766   : > { %2130 = vmatprep.mubr.bf16.mxu1 %v4112_v28  ;;  %2099 = vmatpush1.bf16.msra.mxu1 %v3526_v11 }
 0x767   : > { %2100 = vmatprep.subr.bf16.mxu1 %v3531_v20 }
 0x76a   : > { %2101 = vmatpush1.bf16.msra.mxu1 %v3529_v21 }
 0x76b   : > { %2102 = vmatprep.subr.bf16.mxu1 %v3534_v22 }
 0x76e   : > { %2103 = vmatpush1.bf16.msra.mxu1 %v3532_v23 }
 0x76f   : > { %2104 = vmatprep.subr.bf16.mxu1 %v3537_v25 }
 0x772   : > { %2105 = vmatpush1.bf16.msra.mxu1 %v3535_v24 }
 0x773   : > { %2106 = vmatprep.subr.bf16.mxu1 %v3540_v26 }
 0x776   : > { %2107 = vmatpush1.bf16.msra.mxu1 %v3538_v27 }
 0x815   : > { %v1548_v28 = vpop.f32.mrf.mxu1 }
 0x817   : > { %v3184_v30 = vpop.f32.mrf.mxu1 }
 0x818   : > { %v3541_v30 = vld [vmem:[%s4523_s17 + $0x20] ss:$8 sps:$4 sm:$0xff]  }
 0x819   : > { %v1551_v32 = vpop.f32.mrf.mxu1 }
 0x81a   : > { %v3471_v33 = vpack.i.bf16 %v1551_v32, %v1548_v28  ;;  %v3543_v28 = vld [vmem:[%s4523_s17 + $0x24] ss:$8 sps:$4 sm:$0xff]   ;;  %v3544_v32 = vld [vmem:[%s4523_s17 + $0x10] ss:$8 sps:$4 sm:$0xff]  }
 0x81b   : > { %v3185_v35 = vpop.f32.mrf.mxu1  ;;  %2108 = vmatprep.subr.bf16.mxu1 %v3543_v28 }
 0x81c   : > { %3472 = vrot.lane.b32.xlu1 %v3471_v33, %s4116_s12  ;;  %2109 = vmatpush1.bf16.msra.mxu1 %v3541_v30  ;;  %v3549_v33 = vld [vmem:[%s4523_s17 + $0x4] ss:$8 sps:$4 sm:$0xff]   ;;  %s5003_s17 = scalar_lea.vmem [#allocation9], %s4514_s22 }
 0x81d   : > { %v1671_v36 = vpop.f32.mrf.mxu1  ;;  %2110 = vmatprep.subr.bf16.mxu1 %v3546_v31 }
 0x81f   : > { %v3196_v37 = vpop.f32.mrf.mxu1 }
 0x820   : > { %2111 = vmatpush1.bf16.msra.mxu1 %v3544_v32 }
 0x821   : > { %v1674_v39 = vpop.f32.mrf.mxu1  ;;  %2112 = vmatprep.subr.bf16.mxu1 %v3549_v33 }
 0x822   : > { %v3476_v40 = vpack.i.bf16 %v1674_v39, %v1671_v36 }
 0x823   : > { %v3197_v41 = vpop.f32.mrf.mxu1 }
 0x824   : > { %3477 = vrot.lane.b32.xlu0 %v3476_v40, %s4117_s13  ;;  %2113 = vmatpush1.bf16.msra.mxu1 %v3547_v34 }
 0x825   : > { %v1794_v42 = vpop.f32.mrf.mxu1 }
 0x827   : > { %v3208_v43 = vpop.f32.mrf.mxu1 }
 0x828   : > { %v3007_v43 = vld [vmem:[%s5002_s26] ss:$0 sm:$0xff] }
 0x829   : > { %v1797_v44 = vpop.f32.mrf.mxu1 }
 0x82a   : > { %v3481_v45 = vpack.i.bf16 %v1797_v44, %v1794_v42 }
 0x82b   : > { %v3209_v46 = vpop.f32.mrf.mxu1 }
 0x82c   : > { %3482 = vrot.lane.b32.xlu1 %v3481_v45, %s4115_s11 }
 0x88e   : > { %v3473_v47 = vpop.permute.xlu1 %3472 }
 0x88f   : > { %v3475_v51 = vunpack.i.h.bf16 %v3473_v47  ;;  %v3474_v52 = vunpack.i.l.bf16 %v3473_v47  ;;  %v3008_v47 = vld [vmem:[%s5003_s17] ss:$0 sm:$0xff] }
 0x891   : > { %v1826_v55 = vsel %vm1311_vm1, %v4677_v63, %v3475_v51  ;;  %v1825_v58 = vsel %vm1311_vm1, %v4675_v59, %v3474_v52 }
 0x896   : > { %v3478_v48 = vpop.permute.xlu0 %3477 }
 0x897   : > { %v3480_v29 = vunpack.i.h.bf16 %v3478_v48  ;;  %v3479_v53 = vunpack.i.l.bf16 %v3478_v48 }
 0x899   : > { %v1829_v62 = vsel %vm1827_vm3, %v1826_v55, %v3480_v29  ;;  %v1828_v1 = vsel %vm1827_vm3, %v1825_v58, %v3479_v53  ;;  %v3550_v53 = vld [vmem:[%s4525_s8 + $0x78] sm:$0xff]   ;;  %v3552_v55 = vld [vmem:[%s4525_s8 + $0x70] sm:$0xff]  }
 0x89a   : > { %3102 = vmatprep.subr.bf16.mxu0 %v3550_v53  ;;  %v3553_v58 = vld [vmem:[%s4525_s8 + $0x30] sm:$0xff]  }
 0x89e   : > { %v3483_v54 = vpop.permute.xlu1 %3482 }
 0x89f   : > { %v3485_v60 = vunpack.i.h.bf16 %v3483_v54  ;;  %v3484_v61 = vunpack.i.l.bf16 %v3483_v54  ;;  %v3551_v54 = vld [vmem:[%s4525_s8 + $0x38] sm:$0xff]  }
 0x8a1   : > { %v1832_v2 = vsel %vm1830_vm4, %v1829_v62, %v3485_v60  ;;  %v1831_v3 = vsel %vm1830_vm4, %v1828_v1, %v3484_v61  ;;  %v3554_v60 = vld [vmem:[%s4525_s8 + $0x68] sm:$0xff]   ;;  %v3556_v62 = vld [vmem:[%s4525_s8 + $0x60] sm:$0xff]  }
 0x8a2   : > { %v1833_v4 = vpack.c.bf16 %v1832_v2, %v1831_v3  ;;  %v3555_v61 = vld [vmem:[%s4525_s8 + $0x28] sm:$0xff]   ;;  %v3557_v1 = vld [vmem:[%s4525_s8 + $0x20] sm:$0xff]   ;;  %v3558_v2 = vld [vmem:[%s4525_s8 + $0x58] sm:$0xff]  }
 0x8a3   : > { %v3559_v3 = vld [vmem:[%s4525_s8 + $0x18] sm:$0xff]  }
 0x8a4   : > { %3227 = vmatmul.mubr.bf16.vlgmr.msra.gmra.mxu0 %v1833_v4  ;;  %v3560_v4 = vld [vmem:[%s4525_s8 + $0x50] sm:$0xff]  }
 0x8a5   : > { %3103 = vmatpush3.bf16.msra.mxu0 %v3551_v54 }
 0x8a6   : > { %3104 = vmatprep.subr.bf16.mxu0 %v3552_v55 }
 0x8a9   : > { %3105 = vmatpush3.bf16.msra.mxu0 %v3553_v58 }
 0x8aa   : > { %3106 = vmatprep.subr.bf16.mxu0 %v3554_v60 }
 0x8ad   : > { %3107 = vmatpush3.bf16.msra.mxu0 %v3555_v61 }
 0x8ae   : > { %3108 = vmatprep.subr.bf16.mxu0 %v3556_v62 }
 0x8b1   : > { %3109 = vmatpush3.bf16.msra.mxu0 %v3557_v1 }
 0x8b2   : > { %3110 = vmatprep.subr.bf16.mxu0 %v3558_v2 }
 0x8b5   : > { %3111 = vmatpush3.bf16.msra.mxu0 %v3559_v3 }
 0x8b6   : > { %3112 = vmatprep.subr.bf16.mxu0 %v3560_v4 }
 0x964   : > { %v1939_v6 = vpop.f32.mrf.mxu0 }
 0x965   : > { %v1940_v63 = vadd.f32 %v2998_v5, %v1939_v6  ;;  %v3562_v6 = vld [vmem:[%s4525_s8 + $0x48] sm:$0xff]  }
 0x966   : > { %v3228_v7 = vpop.f32.mrf.mxu0 }
 0x967   : > { %v1946_v59 = vadd.f32 %v1940_v63, %v4607_v49  ;;  %v3563_v63 = vld [vmem:[%s4525_s8 + $0x8] sm:$0xff]   ;;  %v3564_v7 = vld [vmem:[%s4525_s8 + $0x40] sm:$0xff]  }
 0x968   : > { %v1942_v8 = vpop.f32.mrf.mxu0 }
 0x969   : > { %v1943_v17 = vadd.f32 %v2998_v5, %v1942_v8  ;;  %1950 = vadd.xlane.f32.xlu0 %v1946_v59  ;;  %v3561_v5 = vld [vmem:[%s4525_s8 + $0x10] sm:$0xff]   ;;  %v2006_v8 = vld [vmem:[%s4574_s1] sm:$0x3] }
 0x96a   : > { %v3229_v9 = vpop.f32.mrf.mxu0  ;;  %3113 = vmatpush3.bf16.msra.mxu0 %v3561_v5 }
 0x96b   : > { %v1947_v10 = vadd.f32 %v1943_v17, %v4609_v50  ;;  %3114 = vmatprep.subr.bf16.mxu0 %v3562_v6  ;;  %v2011_v17 = vrot.slane %v2006_v8, %v1083_v0  ;;  %v2015_v9 = vrot.slane %v2006_v8, %v1087_v57 }
 0x96d   : > { %1952 = vadd.xlane.f32.xlu1 %v1947_v10 }
 0x96e   : > { %3115 = vmatpush3.bf16.msra.mxu0 %v3563_v63 }
 0x96f   : > { %3116 = vmatprep.subr.bf16.mxu0 %v3564_v7 }
 0x9f2   : > { %v1951_v13 = vpop.xlane.xlu0 %1950 }
 0x9f3   : > { %v1955_v14 = vmul.f32 0.0078125, %v1951_v13 }
 0x9f5   : > { %v1957_v15 = vsub.f32 %v1946_v59, %v1955_v14  ;;  %v3565_v59 = vld [vmem:[%s4525_s8] sm:$0xff]   ;;  %s5004_s8 = scalar_lea.vmem [#allocation12], %s4514_s22 }
 0x9f6   : > { %v1953_v49 = vpop.xlane.xlu1 %1952  ;;  %3117 = vmatpush3.bf16.msra.mxu0 %v3565_v59  ;;  %v3025_v60 = vld [vmem:[%s5004_s8] ss:$0 sm:$0xff] }
 0x9f7   : > { %v1956_v16 = vmul.f32 0.0078125, %v1953_v49  ;;  %v1959_v18 = vmul.f32 %v1957_v15, %v1957_v15 }
 0x9f9   : > { %v1958_v19 = vsub.f32 %v1947_v10, %v1956_v16  ;;  %1961 = vadd.xlane.f32.xlu0 %v1959_v18 }
 0x9fb   : > { %v1960_v50 = vmul.f32 %v1958_v19, %v1958_v19 }
 0x9fd   : > { %1963 = vadd.xlane.f32.xlu0 %v1960_v50 }
 0xa82   : > { %v1962_v35 = vpop.xlane.xlu0 %1961 }
 0xa83   : > { %v1965_v36 = vmul.f32 0.0078125, %v1962_v35 }
 0xa85   : > { %v1967_v37 = vadd.f32 1e-12, %v1965_v36 }
 0xa86   : > { %v1964_v38 = vpop.xlane.xlu0 %1963 }
 0xa87   : > { %3598 = vrsqrt.f32 %v1967_v37  ;;  %v1966_v39 = vmul.f32 0.0078125, %v1964_v38 }
 0xa89   : > { %v1968_v40 = vadd.f32 1e-12, %v1966_v39 }
 0xa8b   : > { %3600 = vrsqrt.f32 %v1968_v40 }
 0xa94   : > { %v3599_v41 = vpop.eup %3598 }
 0xa95   : > { %v1971_v42 = vmul.f32 %v3599_v41, %v1957_v15 }
 0xa97   : > { %v1979_v46 = vmul.f32 %v3007_v43, %v1971_v42 }
 0xa98   : > { %v3601_v44 = vpop.eup %3600 }
 0xa99   : > { %v1972_v45 = vmul.f32 %v3601_v44, %v1958_v19  ;;  %v4756_v51 = vadd.f32 %v3008_v47, %v1979_v46 }
 0xa9b   : > { %v1980_v48 = vmul.f32 %v3007_v43, %v1972_v45 }
 0xa9d   : > { %v4758_v52 = vadd.f32 %v3008_v47, %v1980_v48 }
 0xa9f   : > { %v1989_v29 = vpack.c.bf16 %v4758_v52, %v4756_v51 }
 0xaa1   : > { %2131 = vmatmul.mubr.bf16.vlgmr.msra.gmra.mxu1 %v1989_v29 }
 0xb61   : > { %v2132_v10 = vpop.f32.mrf.mxu1 }
 0xb62   : > { %v2133_v11 = vadd.f32 %v2132_v10, %v2011_v17 }
 0xb63   : > { %v2134_v12 = vpop.f32.mrf.mxu1 }
 0xb64   : > { %v2141_v13 = vmul.f32 %v2133_v11, %v2133_v11  ;;  %v2135_v14 = vadd.f32 %v2134_v12, %v2015_v9 }
 0xb65   : > { %v2136_v15 = vpop.f32.mrf.mxu1 }
 0xb66   : > { %v2145_v49 = vmul.f32 %v2141_v13, %v2133_v11  ;;  %v2142_v16 = vmul.f32 %v2135_v14, %v2135_v14  ;;  %v2137_v18 = vadd.f32 %v2136_v15, %v2011_v17 }
 0xb67   : > { %v2138_v19 = vpop.f32.mrf.mxu1 }
 0xb68   : > { %v2149_v50 = vmul.f32 0.044715, %v2145_v49  ;;  %v2146_v20 = vmul.f32 %v2142_v16, %v2135_v14  ;;  %v2143_v21 = vmul.f32 %v2137_v18, %v2137_v18  ;;  %v2139_v22 = vadd.f32 %v2138_v19, %v2015_v9 }
 0xb6a   : > { %v2153_v23 = vadd.f32 %v2149_v50, %v2133_v11  ;;  %v2150_v24 = vmul.f32 0.044715, %v2146_v20  ;;  %v2147_v0 = vmul.f32 %v2143_v21, %v2137_v18  ;;  %v2144_v25 = vmul.f32 %v2139_v22, %v2139_v22  ;;  %v3043_v50 = vld [vmem:[%s5006_s28] ss:$0 sm:$0xff] }
 0xb6c   : > { %v2157_v56 = vmul.f32 0.7978846, %v2153_v23  ;;  %v2154_v57 = vadd.f32 %v2150_v24, %v2135_v14  ;;  %v2151_v26 = vmul.f32 0.044715, %v2147_v0  ;;  %v2148_v27 = vmul.f32 %v2144_v25, %v2139_v22 }
 0xb6e   : > { %v2158_v28 = vmul.f32 0.7978846, %v2154_v57  ;;  %v2155_v30 = vadd.f32 %v2151_v26, %v2137_v18  ;;  %v2152_v31 = vmul.f32 0.044715, %v2148_v27  ;;  %3602 = vtanh.f32 %v2157_v56 }
 0xb70   : > { %3604 = vtanh.f32 %v2158_v28  ;;  %v2159_v32 = vmul.f32 0.7978846, %v2155_v30  ;;  %v2156_v33 = vadd.f32 %v2152_v31, %v2139_v22 }
 0xb72   : > { %3606 = vtanh.f32 %v2159_v32  ;;  %v2160_v34 = vmul.f32 0.7978846, %v2156_v33 }
 0xb74   : > { %3608 = vtanh.f32 %v2160_v34 }
 0xb7b   : > { %v3603_v35 = vpop.eup %3602 }
 0xb7c   : > { %v2165_v39 = vadd.f32 1.0, %v3603_v35 }
 0xb7d   : > { %v3605_v36 = vpop.eup %3604 }
 0xb7e   : > { %v2166_v37 = vadd.f32 1.0, %v3605_v36  ;;  %v2169_v45 = vmul.f32 0.5, %v2165_v39 }
 0xb7f   : > { %v3607_v38 = vpop.eup %3606 }
 0xb80   : > { %v2167_v40 = vadd.f32 1.0, %v3607_v38  ;;  %v2170_v44 = vmul.f32 0.5, %v2166_v37  ;;  %v2173_v53 = vmul.f32 %v2169_v45, %v2133_v11 }
 0xb81   : > { %v3609_v41 = vpop.eup %3608 }
 0xb82   : > { %v2171_v42 = vmul.f32 0.5, %v2167_v40  ;;  %v2168_v43 = vadd.f32 1.0, %v3609_v41  ;;  %v2174_v48 = vmul.f32 %v2170_v44, %v2135_v14 }
 0xb84   : > { %v2172_v46 = vmul.f32 0.5, %v2168_v43  ;;  %v2175_v47 = vmul.f32 %v2171_v42, %v2137_v18  ;;  %v3042_v18 = vld [vmem:[%s5005_s7] ss:$0 sm:$0xff] }
 0xb86   : > { %v2176_v29 = vmul.f32 %v2172_v46, %v2139_v22  ;;  %v2177_v55 = vpack.c.bf16 %v2175_v47, %v2173_v53 }
 0xb88   : > { %v2178_v54 = vpack.c.bf16 %v2176_v29, %v2174_v48 }
 0xb8a   : > { %2346 = vmatprep.mubr.bf16.mxu0 %v2178_v54 }
 0xb8b   : > { %2347 = vmatmul.mubr.bf16.vlgmr.msra.gmra.mxu0 %v2177_v55 }
 0xc4b   : > { %v3118_v58 = vpop.f32.mrf.mxu0 }
 0xc4d   : > { %v3119_v61 = vpop.f32.mrf.mxu0 }
 0xc4e   : > { %v3120_v62 = vadd.f32 %v3119_v61, %v3118_v58 }
 0xc4f   : > { %v3121_v1 = vpop.f32.mrf.mxu0 }
 0xc50   : > { %v2349_v2 = vadd.f32 %v3120_v62, %v3025_v60 }
 0xc51   : > { %v3122_v3 = vpop.f32.mrf.mxu0 }
 0xc52   : > { %v3123_v4 = vadd.f32 %v3122_v3, %v3121_v1  ;;  %v2355_v5 = vadd.f32 %v2349_v2, %v4756_v51 }
 0xc54   : > { %v2352_v6 = vadd.f32 %v3123_v4, %v3025_v60  ;;  %2359 = vadd.xlane.f32.xlu0 %v2355_v5 }
 0xc56   : > { %v2356_v63 = vadd.f32 %v2352_v6, %v4758_v52 }
 0xc58   : > { %2361 = vadd.xlane.f32.xlu1 %v2356_v63 }
 0xcdd   : > { %v2360_v7 = vpop.xlane.xlu0 %2359 }
 0xcde   : > { %v2363_v59 = vmul.f32 0.0078125, %v2360_v7 }
 0xce0   : > { %v2365_v8 = vsub.f32 %v2355_v5, %v2363_v59 }
 0xce1   : > { %v2362_v17 = vpop.xlane.xlu1 %2361 }
 0xce2   : > { %v2364_v9 = vmul.f32 0.0078125, %v2362_v17  ;;  %v2367_v10 = vmul.f32 %v2365_v8, %v2365_v8 }
 0xce4   : > { %v2366_v11 = vsub.f32 %v2356_v63, %v2364_v9  ;;  %2369 = vadd.xlane.f32.xlu0 %v2367_v10 }
 0xce6   : > { %v2368_v12 = vmul.f32 %v2366_v11, %v2366_v11 }
 0xce8   : > { %2371 = vadd.xlane.f32.xlu1 %v2368_v12 }
 0xd6d   : > { %v2370_v13 = vpop.xlane.xlu0 %2369 }
 0xd6e   : > { %v2373_v14 = vmul.f32 0.0078125, %v2370_v13 }
 0xd70   : > { %v2375_v51 = vadd.f32 1e-12, %v2373_v14 }
 0xd71   : > { %v2372_v15 = vpop.xlane.xlu1 %2371 }
 0xd72   : > { %3610 = vrsqrt.f32 %v2375_v51  ;;  %v2374_v49 = vmul.f32 0.0078125, %v2372_v15 }
 0xd74   : > { %v2376_v52 = vadd.f32 1e-12, %v2374_v49 }
 0xd76   : > { %3612 = vrsqrt.f32 %v2376_v52 }
 0xd7f   : > { %v3611_v16 = vpop.eup %3610 }
 0xd80   : > { %v2379_v19 = vmul.f32 %v3611_v16, %v2365_v8 }
 0xd82   : > { %v2387_v20 = vmul.f32 %v3042_v18, %v2379_v19 }
 0xd83   : > { %v3613_v21 = vpop.eup %3612 }
 0xd84   : > { %v2395_v22 = vadd.f32 %v3043_v50, %v2387_v20  ;;  %v2380_v23 = vmul.f32 %v3613_v21, %v2366_v11 }
 0xd86   : > { %2397 = vst [vmem:[#allocation2] sm:$0xff] %v2395_v22  ;;  %v2388_v24 = vmul.f32 %v3042_v18, %v2380_v23  ;;  %2402 = sbr.rel (%p3044_p7) target bundleno = 3910 (0xf46), region = 152 }
 0xd88   : > { %v2396_v0 = vadd.f32 %v3043_v50, %v2388_v24 }
 0xd8a   : > { %2398 = vst [vmem:[#allocation2 + $0x8] sm:$0xff] %v2396_v0 }
 0xd8b   : > { %v3614_v25 = vld [vmem:[#allocation15 + $0x38] sm:$0xff]   ;;  %v4118_v56 = vmov 0.0   ;;  %v3615_v57 = vld [vmem:[#allocation15 + $0x30] sm:$0xff]   ;;  %vm4119_vm5 = vmmov 0   ;;  %v3616_v26 = vld [vmem:[#allocation15 + $0x28] sm:$0xff]   ;;  %v2403_v36 = vpack.c.bf16 %v2395_v22, %v2395_v22  ;;  %vm2616_vm6 = vcmask 8192  }
 0xd8c   : > { %3230 = vmatprep.subr.bf16.mxu0 %v4118_v56  ;;  %3250 = vmatprep.subr.bf16.mxu1 %v4118_v56  ;;  %v3622_v27 = vld [vmem:[%s5008_s9 + $0x38] sm:$0xff]   ;;  %v3623_v30 = vld [vmem:[%s5008_s9 + $0x30] sm:$0xff]   ;;  %v3624_v32 = vld [vmem:[%s5008_s9 + $0x28] sm:$0xff]  }
 0xd8d   : > { %3231 = vmatpush3.bf16.msra.mxu0 %v3614_v25  ;;  %3246 = vmatprep.mubr.msk.bf16.mxu0 %vm4119_vm5, %v4118_v56  ;;  %v3617_v28 = vld [vmem:[#allocation15 + $0x20] sm:$0xff]   ;;  %v3618_v31 = vld [vmem:[#allocation15 + $0x18] sm:$0xff]   ;;  %v3619_v33 = vld [vmem:[#allocation15 + $0x10] sm:$0xff]  }
 0xd8e   : > { %3232 = vmatprep.subr.bf16.mxu0 %v4118_v56  ;;  %3266 = vmatprep.mubr.msk.bf16.mxu1 %vm4119_vm5, %v4118_v56  ;;  %v3620_v34 = vld [vmem:[#allocation15 + $0x8] sm:$0xff]   ;;  %v3621_v35 = vld [vmem:[#allocation15] sm:$0xff]   ;;  %v3627_v39 = vld [vmem:[%s5008_s9 + $0x10] sm:$0xff]  }
 0xd8f   : > { %3251 = vmatpush3.bf16.msra.mxu1 %v3622_v27  ;;  %v3625_v37 = vld [vmem:[%s5008_s9 + $0x20] sm:$0xff]   ;;  %v3626_v38 = vld [vmem:[%s5008_s9 + $0x18] sm:$0xff]   ;;  %v3628_v40 = vld [vmem:[%s5008_s9 + $0x8] sm:$0xff]  }
 0xd90   : > { %3252 = vmatprep.subr.bf16.mxu1 %v4118_v56  ;;  %v3629_v41 = vld [vmem:[%s5008_s9] sm:$0xff]   ;;  %v2420_v42 = vld [vmem:[#allocation16] sm:$0x1] }
 0xd91   : > { %3233 = vmatpush3.bf16.msra.mxu0 %v3615_v57  ;;  %v2527_v53 = vld [vmem:[#allocation18] sm:$0x1] }
 0xd92   : > { %3234 = vmatprep.subr.bf16.mxu0 %v4118_v56 }
 0xd93   : > { %3253 = vmatpush3.bf16.msra.mxu1 %v3623_v30 }
 0xd94   : > { %3254 = vmatprep.subr.bf16.mxu1 %v4118_v56 }
 0xd95   : > { %3235 = vmatpush3.bf16.msra.mxu0 %v3616_v26 }
 0xd96   : > { %3236 = vmatprep.subr.bf16.mxu0 %v4118_v56 }
 0xd97   : > { %3255 = vmatpush3.bf16.msra.mxu1 %v3624_v32 }
 0xd98   : > { %3256 = vmatprep.subr.bf16.mxu1 %v4118_v56 }
 0xd99   : > { %3237 = vmatpush3.bf16.msra.mxu0 %v3617_v28 }
 0xd9a   : > { %3238 = vmatprep.subr.bf16.mxu0 %v4118_v56 }
 0xd9b   : > { %3257 = vmatpush3.bf16.msra.mxu1 %v3625_v37 }
 0xd9c   : > { %3258 = vmatprep.subr.bf16.mxu1 %v4118_v56 }
 0xd9d   : > { %3239 = vmatpush3.bf16.msra.mxu0 %v3618_v31 }
 0xd9e   : > { %3240 = vmatprep.subr.bf16.mxu0 %v4118_v56 }
 0xd9f   : > { %3259 = vmatpush3.bf16.msra.mxu1 %v3626_v38 }
 0xda0   : > { %3260 = vmatprep.subr.bf16.mxu1 %v4118_v56 }
 0xda1   : > { %3241 = vmatpush3.bf16.msra.mxu0 %v3619_v33 }
 0xda2   : > { %3242 = vmatprep.subr.bf16.mxu0 %v4118_v56 }
 0xda3   : > { %3261 = vmatpush3.bf16.msra.mxu1 %v3627_v39 }
 0xda4   : > { %3262 = vmatprep.subr.bf16.mxu1 %v4118_v56 }
 0xda5   : > { %3243 = vmatpush3.bf16.msra.mxu0 %v3620_v34 }
 0xda6   : > { %3244 = vmatprep.subr.bf16.mxu0 %v4118_v56 }
 0xda7   : > { %3263 = vmatpush3.bf16.msra.mxu1 %v3628_v40 }
 0xda8   : > { %3264 = vmatprep.subr.bf16.mxu1 %v4118_v56 }
 0xda9   : > { %3245 = vmatpush3.bf16.msra.mxu0 %v3621_v35 }
 0xdab   : > { %3265 = vmatpush3.bf16.msra.mxu1 %v3629_v41 }
 0xdac   : > { %3247 = vmatmul.mubr.bf16.vlgmr.msra.gmra.mxu0 %v2403_v36 }
 0xe6c   : > { %v2503_v43 = vpop.f32.mrf.mxu0 }
 0xe6d   : > { %v2504_v44 = vadd.f32 %v2503_v43, %v2420_v42 }
 0xe6e   : > { %v3248_v45 = vpop.f32.mrf.mxu0 }
 0xe6f   : > { %3630 = vtanh.f32 %v2504_v44 }
 0xe70   : > { %v2506_v46 = vpop.f32.mrf.mxu0 }
 0xe72   : > { %v3249_v47 = vpop.f32.mrf.mxu0 }
 0xe7c   : > { %v3631_v48 = vpop.eup %3630 }
 0xe7d   : > { %v2510_v29 = vpack.c.bf16 %v3631_v48, %v3631_v48 }
 0xe7f   : > { %3267 = vmatmul.mubr.bf16.vlgmr.msra.gmra.mxu1 %v2510_v29 }
 0xf3f   : > { %v2610_v54 = vpop.f32.mrf.mxu1 }
 0xf40   : > { %v2611_v55 = vadd.f32 %v2610_v54, %v2527_v53 }
 0xf41   : > { %v3268_v58 = vpop.f32.mrf.mxu1 }
 0xf42   : > { %2617 = vst.msk [vmem:[%s4578_s29] sm:$0x1] %vm2616_vm6, %v2611_v55 }
 0xf43   : > { %v2613_v60 = vpop.f32.mrf.mxu1 }
 0xf45   : > { %v3269_v61 = vpop.f32.mrf.mxu1 }
 0xf46 PF: > { %s5009_s12 = sld [smem:[#allocation32_spill]]  ;;  %s2631_s7 = sshll.u32 %s4578_s29, 4  ;;  %s2632_s7 = int_to_ptr.vmem [resolvable:$true] %s2631_s7 }
 0xf47   : > { %s5010_s13 = sld [smem:[#allocation27_spill]]  ;;  %s3958_s22 = scalar_lea.vmem %s2632_s7, 16 }
 0xf48   : > { %s5011_s14 = sld [smem:[#allocation38_spill]]  ;;  %p3959_p4 = scmp.ne.s32.totalorder %s2632_s7, %s3958_s22 }
 0xf49   : > { %s5012_s17 = sld [smem:[#allocation62_spill]]  ;;  %s4120_s2 = smov [#allocation19]  }
 0xf4a   : > { %s3962_s21 = sshll.u32 %s4120_s2, 4  ;;  %s3963_s21 = int_to_ptr.vmem [resolvable:$false] %s3962_s21 }
 0xf4b   : > { %s3964_s25 = scalar_lea.vmem %s3963_s21, 32  ;;  %p3965_p9 = scmp.lt.s32.totalorder %s2632_s7, %s3963_s21 }
 0xf4c   : > { %s3061_s15 = sshll.u32 %s5009_s12, 4  ;;  %p3966_p11 = scmp.lt.s32.totalorder %s3964_s25, %s3958_s22 }
 0xf4d   : > { %s5013_s28 = sand.u32 1, %s5010_s13  }
 0xf4e   : > { %s2619_s10 = scalar_lea.sflag [#allocation5], %s5013_s28  ;;  %p5014_p13 = scmp.ne.s32.totalorder %s5011_s14, 0 }
 0xf4f   : > { %s2629_s8 = scalar_lea.hbm %s5012_s17, %s3061_s15  ;;  %p3967_p2 = por %p3966_p11, %p3965_p9 }
 0xf50   : > { %p3960_p1 = pnand %p3959_p4, %p5014_p13 }
 0xf52   : > { %p3961_p5 = pneg %p3960_p1 }
 0xf54   : > { %p3968_p8 = pnand %p3967_p2, %p3961_p5 }
 0xf56   : > { %3971 = shalt.err (!%p3968_p8)
}
 0xf57   : > { %s3972_s4 = scalar_lea.hbm %s2629_s8, 16  ;;  %s3976_s5 = scalar_lea.hbm %s5012_s17, 32 }
 0xf58   : > { %p3973_p0 = scmp.ne.s32.totalorder %s2629_s8, %s3972_s4  ;;  %p3977_p3 = scmp.lt.s32.totalorder %s2629_s8, %s5012_s17 }
 0xf59   : > { %p3978_p12 = scmp.lt.s32.totalorder %s3976_s5, %s3972_s4 }
 0xf5a   : > { %p3974_p6 = pnand %p3973_p0, %p5014_p13 }
 0xf5b   : > { %p3979_p7 = por %p3978_p12, %p3977_p3 }
 0xf5c   : > { %p3975_p10 = pneg %p3974_p6 }
 0xf5e   : > { %p3980_p4 = pnand %p3979_p7, %p3975_p10 }
 0xf60   : > { %3983 = shalt.err (!%p3980_p4)
}
 0xf61   : > { %3306 = dma.vmem_to_hbm [thread:$0]  (%p5014_p13), %s2632_s7, 16, %s2629_s8, %s2619_s10  }
 0xf62 PF: > { %s5015_s20 = sld [smem:[#allocation35_spill]] }
 0xf63   : > { %s5016_s23 = sld [smem:[#allocation26_spill]] }
 0xf64   : > { %s5017_s27 = sld [smem:[#allocation39_spill]] }
 0xf68   : > { %p3361_p1 = scmp.ge.s32.totalorder %s5015_s20, 2 }
 0xf69   : > { %s2643_s0 = sand.u32 1, %s5016_s23  }
 0xf6a   : > { %p5018_p5 = scmp.ne.s32.totalorder %s5017_s27, 0  ;;  %s2644_s1 = scalar_lea.sflag [#allocation5], %s2643_s0 }
 0xf6c   : > { %p3347_p9 = pnand %p3361_p1, %p5018_p5 }
 0xf6e   : > { %p3348_p11 = pneg %p3347_p9 }
 0xf70   : > { %4049 = dma.done.wait (%p3348_p11), %s2644_s1, 16  }
 0xf71   : > { %4051 = vsyncadd (%p3348_p11), %s2644_s1, 4294967280  ;;  %s35_s3 = sadd.s32 1, %s5015_s20   ;;  %s5019_s0 = sld [smem:[#allocation27_spill]] }
 0xf72   : > { %p32_p2 = scmp.ge.s32.totalorder %s35_s3, 6   ;;  %s5020_s30 = sld [smem:[#allocation28_spill]] }
 0xf73   : > { %s5021_s20 = sld [smem:[#allocation44_spill]] }
 0xf74   : > { %s5022_s21 = sld [smem:[#allocation29_spill]] }
 0xf75   : > { %s5023_s1 = sld [smem:[#allocation30_spill]] }
 0xf76   : > { %s5024_s22 = sld [smem:[#allocation43_spill]]  ;;  %34 = sbr.rel (!%p32_p2) target bundleno = 29 (0x1d), region = 252 }
 0xf77   : > { %s5025_s2 = sld [smem:[#allocation33_spill]] }
 0xf78   : > { %s5026_s23 = sld [smem:[#allocation34_spill]] }
 0xf79   : > { %s5027_s24 = sld [smem:[#allocation41_spill]] }
 0xf7a   : > { %s5028_s25 = sld [smem:[#allocation42_spill]] }
 0xf7b   :  { %2648 = vsyncpa [#allocation4], 1 }
 0xf7c   :  { %2650 = vsyncpa [#allocation4 + $0x1], 1 }
 0xf7d   :  { %2651 = vsyncpa [#allocation7], 1 }
 0xf7e   :  { %2652 = vsyncpa [#allocation17], 1 }
 0xf7f   :  { %2653 = vsyncpa [#allocation5], 1 }
 0xf80   :  { %2655 = vsyncpa [#allocation5 + $0x1], 1 }

</bundles_post_ra>
